<compile_context>
chip_gen: v7x
topology: tpu7x:2x2x1
jax: 0.10.0
libtpu: 0.0.40
codegen_flags: <defaults>
</compile_context>

<pallas_src>
import math

import jax
import jax.numpy as jnp
from jax.experimental import pallas as pl
from jax.experimental.pallas import tpu as pltpu

# ----------------------------- model config (small) --------------------------
BATCH = 512                # small test batch; 2 grid steps at TILE_B=256

GRID_LEVELS = 8            # grid_encoder_levels
GRID_LEVEL_DIM = 2         # grid_encoder_level_size (features per level)
LOG2_HASHMAP = 12          # grid_encoder_log2_level
BASE_RES = 16
PER_LEVEL_SCALE = 2.0
SH_DEGREE = 4              # spherical_harmonics_level
HIDDEN = 128               # model_width (kept small / lane friendly)

GRID_OUT = GRID_LEVELS * GRID_LEVEL_DIM     # 16
SH_OUT = SH_DEGREE ** 2                     # 16
IN_DIM = GRID_OUT + SH_OUT                  # 32
EPS = 1.0 - 1e-6


def _choose_tile_b(b):
    """Lane-tile selection.

    >=256 so the 256-wide MXU N axis is filled on v6e/v7x; capped at 1024 so
    the (HIDDEN, TILE_B) f32 activation + bf16 copy + double-buffered I/O stay
    well inside v7x's 64 MiB physical VMEM; and when the batch allows, keep
    >=2 grid steps so megacore shards work across both v7x TensorCores.
    A 128/256-row batch stays a single step (splitting a latency-bound tiny
    batch costs more than it wins).
    """
    assert b % 128 == 0 and b > 0, "batch must be a multiple of 128"
    if b <= 256:
        return b
    best = 128                                   # always divides
    for cand in range(256, min(1024, b // 2) + 1, 128):
        if b % cand == 0:
            best = cand
    return best


# ----------------------------- shared SH basis (reference only) ---------------
def _sh_basis(d):
    """Real spherical harmonics, degree 4 (torch-ngp SHEncoder basis).

    d: (N, 3) -> (N, 16).  Used only by the pure-JAX reference; the kernel
    computes the same basis in the transposed (row-per-term) orientation.
    """
    x = d[:, 0:1]
    y = d[:, 1:2]
    z = d[:, 2:3]
    xy, xz, yz = x * y, x * z, y * z
    x2, y2, z2 = x * x, y * y, z * z
    return jnp.concatenate(
        [
            jnp.full_like(x, 0.28209479177387814),
            -0.48860251190291987 * y,
            0.48860251190291987 * z,
            -0.48860251190291987 * x,
            1.0925484305920792 * xy,
            -1.0925484305920792 * yz,
            0.94617469575755997 * z2 - 0.31539156525251999,
            -1.0925484305920792 * xz,
            0.54627421529603959 * (x2 - y2),
            0.59004358992664352 * y * (-3.0 * x2 + y2),
            2.8906114426405538 * xy * z,
            0.45704579946446572 * y * (1.0 - 5.0 * z2),
            0.3731763325901154 * z * (5.0 * z2 - 3.0),
            0.45704579946446572 * x * (1.0 - 5.0 * z2),
            1.4453057213202769 * z * (x2 - y2),
            -0.59004358992664352 * x * (-3.0 * y2 + x2),
        ],
        axis=-1,
    )


# ----------------------------- Pallas kernel ----------------------------------
def _dsdf_kernel(posT_ref, dirT_ref, gfeatT_ref, w0t_ref, w1t_ref, pslab_ref,
                 out_ref, feat_ref):
    # Everything is lane-dense: the batch lives on the 128-wide lane axis.
    x = dirT_ref[0:1, :]                                       # (1, TB) f32
    y = dirT_ref[1:2, :]
    z = dirT_ref[2:3, :]
    xy, xz, yz = x * y, x * z, y * z
    x2, y2, z2 = x * x, y * y, z * z

    # --- fused feature assembly into VMEM scratch -----------------------------
    # rows [0, GRID_OUT): hash-grid features; rows [GRID_OUT, IN_DIM): SH basis.
    feat_ref[0:GRID_OUT, :] = gfeatT_ref[...]
    sh_rows = (
        jnp.full_like(x, 0.28209479177387814),
        -0.48860251190291987 * y,
        0.48860251190291987 * z,
        -0.48860251190291987 * x,
        1.0925484305920792 * xy,
        -1.0925484305920792 * yz,
        0.94617469575755997 * z2 - 0.31539156525251999,
        -1.0925484305920792 * xz,
        0.54627421529603959 * (x2 - y2),
        0.59004358992664352 * y * (-3.0 * x2 + y2),
        2.8906114426405538 * xy * z,
        0.45704579946446572 * y * (1.0 - 5.0 * z2),
        0.3731763325901154 * z * (5.0 * z2 - 3.0),
        0.45704579946446572 * x * (1.0 - 5.0 * z2),
        1.4453057213202769 * z * (x2 - y2),
        -0.59004358992664352 * x * (-3.0 * y2 + x2),
    )
    for i, row in enumerate(sh_rows):
        feat_ref[GRID_OUT + i:GRID_OUT + i + 1, :] = row

    # --- packed constants: col0=b0, col1=b1, col2=w2 column, [0,3]=b2 ---------
    consts = pslab_ref[...]                                    # (H, 8) f32
    b0 = consts[:, 0:1]
    b1 = consts[:, 1:2]
    w2c = consts[:, 2:3]
    b2 = consts[0:1, 3:4]

    # --- MLP trunk: bf16 MXU matmuls, f32 accumulate + elementwise -------------
    hid = jnp.dot(w0t_ref[...], feat_ref[...].astype(jnp.bfloat16),
                  preferred_element_type=jnp.float32) + b0      # (H, TB)
    hid = jnp.maximum(hid, 0.0)
    hid = jnp.dot(w1t_ref[...], hid.astype(jnp.bfloat16),
                  preferred_element_type=jnp.float32) + b1      # (H, TB)
    hid = jnp.maximum(hid, 0.0)

    # Final (1 x H) layer on VPU/XLU instead of an M=1 MXU push/pop:
    # per-lane weighted cross-sublane reduction, b2 folded in.
    u = jnp.sum(w2c * hid, axis=0, keepdims=True) + b2          # (1, TB)

    # Fused ray projection <position, normalized_dir> (lane-dense rows).
    rproj = posT_ref[0:1, :] * x + posT_ref[1:2, :] * y + posT_ref[2:3, :] * z

    # squashing_inv(clip(u, max=eps)) - <position, normalized_dir>.
    # NOTE: the PyTorch reference broadcasts (B,1) - (B,) -> (B,B); we keep the
    # per-ray projection so normalized_dist is the intended per-ray value.
    # The lower clamp (1e-6) only guards log() against u<=0 from untrained
    # weights; it is a no-op wherever the PyTorch reference is finite.
    u_clip = jnp.clip(u, 1e-6, EPS)
    nd = jnp.log(u_clip / (1.0 - u_clip)) - rproj               # (1, TB)

    # Lane-dense output slab: row 0 = normalized, row 1 = unnormalized.
    out_ref[0:1, :] = nd
    out_ref[1:2, :] = u


def dsdf_forward_pallas(position, direction_n, grid_feat, params):
    """position (B,3), direction_n (B,3) already L2-normalized, grid_feat (B,GRID_OUT)."""
    b = position.shape[0]
    w0, b0, w1, b1, w2, b2 = params
    h = w0.shape[1]
    tile_b = _choose_tile_b(b)

    # Only tiny layout plumbing stays in XLA: (B,k)->(k,B) transposes.
    posT = position.T.astype(jnp.float32)                      # (3, B)
    dirT = direction_n.T.astype(jnp.float32)                   # (3, B)
    gfeatT = grid_feat.T.astype(jnp.float32)                   # (GRID_OUT, B)

    w0t = w0.T.astype(jnp.bfloat16)                            # (H, IN_DIM)
    w1t = w1.T.astype(jnp.bfloat16)                            # (H, H)
    pslab = jnp.zeros((h, 8), jnp.float32)                     # packed consts
    pslab = pslab.at[:, 0].set(b0)
    pslab = pslab.at[:, 1].set(b1)
    pslab = pslab.at[:, 2].set(w2[:, 0])
    pslab = pslab.at[0, 3].set(b2[0])

    out = pl.pallas_call(
        _dsdf_kernel,
        out_shape=jax.ShapeDtypeStruct((2, b), jnp.float32),
        grid_spec=pltpu.PrefetchScalarGridSpec(
            num_scalar_prefetch=0,
            grid=(b // tile_b,),
            in_specs=[
                pl.BlockSpec((3, tile_b), lambda i: (0, i)),          # position^T
                pl.BlockSpec((3, tile_b), lambda i: (0, i)),          # normalized dir^T
                pl.BlockSpec((GRID_OUT, tile_b), lambda i: (0, i)),   # grid features^T
                pl.BlockSpec((h, IN_DIM), lambda i: (0, 0)),          # W0^T (bf16)
                pl.BlockSpec((h, h), lambda i: (0, 0)),               # W1^T (bf16)
                pl.BlockSpec((h, 8), lambda i: (0, 0)),               # [b0,b1,w2,b2] slab
            ],
            out_specs=pl.BlockSpec((2, tile_b), lambda i: (0, i)),
            scratch_shapes=[pltpu.VMEM((IN_DIM, tile_b), jnp.float32)],
        ),
        compiler_params=pltpu.CompilerParams(
            dimension_semantics=("parallel",),       # shards steps across v7x TCs
            vmem_limit_bytes=32 * 1024 * 1024,       # explicit: safe on v7x (64 MiB)
        ),
    )(posT, dirT, gfeatT, w0t, w1t, pslab)

    return out[0][:, None], out[1][:, None]                    # (B,1), (B,1)


# ----------------------------- JAX glue ----------------------------------------
def to_rn_matrix(nd):
    dx, dy, dz = nd[:, 0], nd[:, 1], nd[:, 2]
    one_plus_c = 1.0 + dz
    r00 = (1.0 - dx * dx) / one_plus_c
    r11 = (1.0 - dy * dy) / one_plus_c
    r01 = -dx * dy / one_plus_c
    # TODO(synk): the PyTorch reference leaves R[:,0,2] / R[:,1,2] uninitialized
    # (torch.empty); we fill them with the standard "rotate d onto +z" values.
    r02 = -dx
    r12 = -dy
    row0 = jnp.stack([r00, r01, r02], axis=-1)
    row1 = jnp.stack([r01, r11, r12], axis=-1)
    row2 = jnp.stack([-dx, -dy, dz], axis=-1)
    return jnp.stack([row0, row1, row2], axis=1)            # (B, 3, 3)


def preprocess_position_and_directions(position, direction):
    nd = direction / jnp.linalg.norm(direction, axis=-1, keepdims=True)
    rot = to_rn_matrix(nd)
    npos = jnp.einsum("bij,bj->bi", rot, position)
    return npos[:, :2], nd


def hash_grid_encode(x2, embeddings):
    """Multi-resolution hash-grid encoder (tiny-cuda-nn style), 2-D input.

    x2: (B, 2) assumed roughly in [-1, 1]; embeddings: list of (T_l, F) tables.
    TODO(synk): the per-lane data-dependent row gather into ~4K-row tables has
    no clean Mosaic lowering, so this stays in XLA glue even though the tables
    (~260 KB total) would fit VMEM.
    """
    x01 = jnp.clip((x2 + 1.0) * 0.5, 0.0, 1.0)
    hashmap_size = 1 << LOG2_HASHMAP
    feats = []
    for lvl in range(GRID_LEVELS):
        res = int(math.ceil(BASE_RES * (PER_LEVEL_SCALE ** lvl)))
        pos = x01 * (res - 1)
        p0 = jnp.floor(pos)
        frac = pos - p0
        p0 = p0.astype(jnp.int32)
        acc = jnp.zeros((x2.shape[0], GRID_LEVEL_DIM), jnp.float32)
        for cx_off in (0, 1):
            for cy_off in (0, 1):
                cx = jnp.clip(p0[:, 0] + cx_off, 0, res - 1)
                cy = jnp.clip(p0[:, 1] + cy_off, 0, res - 1)
                if res * res <= hashmap_size:
                    idx = cx * res + cy
                else:
                    hashed = (cx.astype(jnp.uint32)
                              ^ (cy.astype(jnp.uint32) * jnp.uint32(2654435761)))
                    idx = (hashed % jnp.uint32(hashmap_size)).astype(jnp.int32)
                wx = frac[:, 0] if cx_off else (1.0 - frac[:, 0])
                wy = frac[:, 1] if cy_off else (1.0 - frac[:, 1])
                acc = acc + (wx * wy)[:, None] * jnp.take(embeddings[lvl], idx, axis=0)
        feats.append(acc)
    return jnp.concatenate(feats, axis=-1)                   # (B, GRID_OUT)


def directional_sdf_forward(position, direction, grid_embeddings, params):
    npos2, ndir = preprocess_position_and_directions(position, direction)
    gfeat = hash_grid_encode(npos2, grid_embeddings)
    return dsdf_forward_pallas(position, ndir, gfeat, params)


# ----------------------------- deterministic init -------------------------------
def init_params(key):
    ks = jax.random.split(key, 5)
    s0 = 1.0 / math.sqrt(IN_DIM)
    s1 = 1.0 / math.sqrt(HIDDEN)
    w0 = s0 * jax.random.normal(ks[0], (IN_DIM, HIDDEN), jnp.float32)
    b0 = 0.01 * jax.random.normal(ks[1], (HIDDEN,), jnp.float32)
    w1 = s1 * jax.random.normal(ks[2], (HIDDEN, HIDDEN), jnp.float32)
    b1 = 0.01 * jax.random.normal(ks[3], (HIDDEN,), jnp.float32)
    # Small final layer + bias 0.5 keeps the untrained output in (0, 1) so the
    # inverse-sigmoid squashing stays finite (as a trained model would).
    w2 = 0.05 * s1 * jax.random.normal(ks[4], (HIDDEN, 1), jnp.float32)
    b2 = jnp.full((1,), 0.5, jnp.float32)
    return (w0, b0, w1, b1, w2, b2)


def init_grid_embeddings(key):
    tables = []
    hashmap_size = 1 << LOG2_HASHMAP
    keys = jax.random.split(key, GRID_LEVELS)
    for lvl in range(GRID_LEVELS):
        res = int(math.ceil(BASE_RES * (PER_LEVEL_SCALE ** lvl)))
        size = min(res * res, hashmap_size)
        tables.append(jax.random.uniform(
            keys[lvl], (size, GRID_LEVEL_DIM), jnp.float32,
            minval=-1e-4, maxval=1e-4))
    return tables


# ----------------------------- pure-JAX reference -------------------------------
def directional_sdf_forward_ref(position, direction, grid_embeddings, params,
                                matmul_dtype=jnp.float32):
    """Reference path.  matmul_dtype=jnp.bfloat16 mirrors the kernel's numerics
    (bf16 matmul operands, f32 accumulate/elementwise)."""
    w0, b0, w1, b1, w2, b2 = params
    npos2, ndir = preprocess_position_and_directions(position, direction)
    gfeat = hash_grid_encode(npos2, grid_embeddings)
    sh = _sh_basis(ndir)
    feat = jnp.concatenate([gfeat, sh], axis=-1)

    def mm(a, w):
        return jnp.dot(a.astype(matmul_dtype), w.astype(matmul_dtype),
                       preferred_element_type=jnp.float32)

    hid = jnp.maximum(mm(feat, w0) + b0[None, :], 0.0)
    hid = jnp.maximum(mm(hid, w1) + b1[None, :], 0.0)
    u = mm(hid, w2) + b2[None, :]
    u_clip = jnp.minimum(u, EPS)
    nd = (jnp.log(u_clip / (1.0 - u_clip))
          - jnp.sum(position * ndir, axis=-1, keepdims=True))
    return nd, u


# ----------------------------- main ---------------------------------------------
if __name__ == "__main__":
    root = jax.random.PRNGKey(0)
    k_pos, k_dir, k_par, k_emb = jax.random.split(root, 4)

    position = jax.random.normal(k_pos, (BATCH, 3), jnp.float32)
    direction = jax.random.normal(k_dir, (BATCH, 3), jnp.float32)

    params = init_params(k_par)
    grid_embeddings = init_grid_embeddings(k_emb)

    ndist, udist = directional_sdf_forward(position, direction, grid_embeddings, params)
    ndist = jax.block_until_ready(ndist)
    udist = jax.block_until_ready(udist)
    assert ndist.shape == (BATCH, 1) and udist.shape == (BATCH, 1)
    assert bool(jnp.all(jnp.isfinite(ndist))) and bool(jnp.all(jnp.isfinite(udist)))

    # (a) tight check against a reference using the same bf16-matmul numerics.
    nd_bf, ud_bf = directional_sdf_forward_ref(
        position, direction, grid_embeddings, params, matmul_dtype=jnp.bfloat16)
    assert jnp.allclose(udist, ud_bf, rtol=5e-3, atol=5e-3), "unnormalized mismatch (bf16 ref)"
    assert jnp.allclose(ndist, nd_bf, rtol=5e-3, atol=5e-3), "normalized mismatch (bf16 ref)"

    # (b) looser semantic check against the pure-f32 reference.
    nd_f32, ud_f32 = directional_sdf_forward_ref(
        position, direction, grid_embeddings, params, matmul_dtype=jnp.float32)
    assert jnp.allclose(udist, ud_f32, rtol=5e-2, atol=5e-2), "unnormalized mismatch (f32 ref)"
    assert jnp.allclose(ndist, nd_f32, rtol=5e-2, atol=5e-2), "normalized mismatch (f32 ref)"

    print("KERNEL_OK")
</pallas_src>

<mosaic_0001>
module attributes {stable_mosaic.version = 11 : i64} {
  func.func @_dsdf_kernel(%arg0: i32, %arg1: memref<3x256xf32, #tpu.memory_space<vmem>>, %arg2: memref<3x256xf32, #tpu.memory_space<vmem>>, %arg3: memref<16x256xf32, #tpu.memory_space<vmem>>, %arg4: memref<128x32xbf16, #tpu.memory_space<vmem>>, %arg5: memref<128x128xbf16, #tpu.memory_space<vmem>>, %arg6: memref<128x8xf32, #tpu.memory_space<vmem>>, %arg7: memref<2x256xf32, #tpu.memory_space<vmem>>, %arg8: memref<32x256xf32, #tpu.memory_space<vmem>>) attributes {dimension_semantics = [#tpu.dimension_semantics<parallel>], iteration_bounds = array<i64: 2>, scalar_prefetch = 0 : i64, scratch_operands = 1 : i64, tpu.core_type = #tpu.core_type<tc>, window_params = [{transform_indices = @transform_0, window_bounds = array<i64: 3, 256>}, {transform_indices = @transform_1, window_bounds = array<i64: 3, 256>}, {transform_indices = @transform_2, window_bounds = array<i64: 16, 256>}, {pipeline_mode = #tpu.pipeline_mode<synchronous>, transform_indices = @transform_3, window_bounds = array<i64: 128, 32>}, {pipeline_mode = #tpu.pipeline_mode<synchronous>, transform_indices = @transform_4, window_bounds = array<i64: 128, 128>}, {pipeline_mode = #tpu.pipeline_mode<synchronous>, transform_indices = @transform_5, window_bounds = array<i64: 128, 8>}, {transform_indices = @transform_6, window_bounds = array<i64: 2, 256>}]} {
    %c0 = arith.constant 0 : index
    %c0_0 = arith.constant 0 : index
    %0 = vector.load %arg2[%c0, %c0_0] : memref<3x256xf32, #tpu.memory_space<vmem>>, vector<1x256xf32>
    %c1 = arith.constant 1 : index
    %c0_1 = arith.constant 0 : index
    %1 = vector.load %arg2[%c1, %c0_1] : memref<3x256xf32, #tpu.memory_space<vmem>>, vector<1x256xf32>
    %c2 = arith.constant 2 : index
    %c0_2 = arith.constant 0 : index
    %2 = vector.load %arg2[%c2, %c0_2] : memref<3x256xf32, #tpu.memory_space<vmem>>, vector<1x256xf32>
    %3 = arith.mulf %0, %1 : vector<1x256xf32>
    %4 = arith.mulf %0, %2 : vector<1x256xf32>
    %5 = arith.mulf %1, %2 : vector<1x256xf32>
    %6 = arith.mulf %0, %0 : vector<1x256xf32>
    %7 = arith.mulf %1, %1 : vector<1x256xf32>
    %8 = arith.mulf %2, %2 : vector<1x256xf32>
    %c0_3 = arith.constant 0 : index
    %c0_4 = arith.constant 0 : index
    %9 = vector.load %arg3[%c0_3, %c0_4] : memref<16x256xf32, #tpu.memory_space<vmem>>, vector<16x256xf32>
    %c0_5 = arith.constant 0 : index
    %c0_6 = arith.constant 0 : index
    %10 = vector.load %arg8[%c0_5, %c0_6] : memref<32x256xf32, #tpu.memory_space<vmem>>, vector<16x256xf32>
    tpu.vector_store %arg8[%c0_5, %c0_6], %9 {strides = array<i32>} : memref<32x256xf32, #tpu.memory_space<vmem>>, vector<16x256xf32>,
    %cst = arith.constant 0.282094806 : f32
    %11 = vector.broadcast %cst : f32 to vector<1x256xf32>
    %cst_7 = arith.constant -0.488602519 : f32
    %12 = vector.broadcast %cst_7 : f32 to vector<1x256xf32>
    %13 = arith.mulf %12, %1 : vector<1x256xf32>
    %cst_8 = arith.constant 0.488602519 : f32
    %14 = vector.broadcast %cst_8 : f32 to vector<1x256xf32>
    %15 = arith.mulf %14, %2 : vector<1x256xf32>
    %cst_9 = arith.constant -0.488602519 : f32
    %16 = vector.broadcast %cst_9 : f32 to vector<1x256xf32>
    %17 = arith.mulf %16, %0 : vector<1x256xf32>
    %cst_10 = arith.constant 1.09254849 : f32
    %18 = vector.broadcast %cst_10 : f32 to vector<1x256xf32>
    %19 = arith.mulf %18, %3 : vector<1x256xf32>
    %cst_11 = arith.constant -1.09254849 : f32
    %20 = vector.broadcast %cst_11 : f32 to vector<1x256xf32>
    %21 = arith.mulf %20, %5 : vector<1x256xf32>
    %cst_12 = arith.constant 0.946174681 : f32
    %22 = vector.broadcast %cst_12 : f32 to vector<1x256xf32>
    %23 = arith.mulf %22, %8 : vector<1x256xf32>
    %cst_13 = arith.constant 0.31539157 : f32
    %24 = vector.broadcast %cst_13 : f32 to vector<1x256xf32>
    %25 = arith.subf %23, %24 : vector<1x256xf32>
    %cst_14 = arith.constant -1.09254849 : f32
    %26 = vector.broadcast %cst_14 : f32 to vector<1x256xf32>
    %27 = arith.mulf %26, %4 : vector<1x256xf32>
    %28 = arith.subf %6, %7 : vector<1x256xf32>
    %cst_15 = arith.constant 0.546274245 : f32
    %29 = vector.broadcast %cst_15 : f32 to vector<1x256xf32>
    %30 = arith.mulf %29, %28 : vector<1x256xf32>
    %cst_16 = arith.constant 0.590043604 : f32
    %31 = vector.broadcast %cst_16 : f32 to vector<1x256xf32>
    %32 = arith.mulf %31, %1 : vector<1x256xf32>
    %cst_17 = arith.constant -3.000000e+00 : f32
    %33 = vector.broadcast %cst_17 : f32 to vector<1x256xf32>
    %34 = arith.mulf %33, %6 : vector<1x256xf32>
    %35 = arith.addf %34, %7 : vector<1x256xf32>
    %36 = arith.mulf %32, %35 : vector<1x256xf32>
    %cst_18 = arith.constant 2.89061141 : f32
    %37 = vector.broadcast %cst_18 : f32 to vector<1x256xf32>
    %38 = arith.mulf %37, %3 : vector<1x256xf32>
    %39 = arith.mulf %38, %2 : vector<1x256xf32>
    %cst_19 = arith.constant 0.457045794 : f32
    %40 = vector.broadcast %cst_19 : f32 to vector<1x256xf32>
    %41 = arith.mulf %40, %1 : vector<1x256xf32>
    %cst_20 = arith.constant 5.000000e+00 : f32
    %42 = vector.broadcast %cst_20 : f32 to vector<1x256xf32>
    %43 = arith.mulf %42, %8 : vector<1x256xf32>
    %cst_21 = arith.constant 1.000000e+00 : f32
    %44 = vector.broadcast %cst_21 : f32 to vector<1x256xf32>
    %45 = arith.subf %44, %43 : vector<1x256xf32>
    %46 = arith.mulf %41, %45 : vector<1x256xf32>
    %cst_22 = arith.constant 0.373176336 : f32
    %47 = vector.broadcast %cst_22 : f32 to vector<1x256xf32>
    %48 = arith.mulf %47, %2 : vector<1x256xf32>
    %cst_23 = arith.constant 5.000000e+00 : f32
    %49 = vector.broadcast %cst_23 : f32 to vector<1x256xf32>
    %50 = arith.mulf %49, %8 : vector<1x256xf32>
    %cst_24 = arith.constant 3.000000e+00 : f32
    %51 = vector.broadcast %cst_24 : f32 to vector<1x256xf32>
    %52 = arith.subf %50, %51 : vector<1x256xf32>
    %53 = arith.mulf %48, %52 : vector<1x256xf32>
    %cst_25 = arith.constant 0.457045794 : f32
    %54 = vector.broadcast %cst_25 : f32 to vector<1x256xf32>
    %55 = arith.mulf %54, %0 : vector<1x256xf32>
    %cst_26 = arith.constant 5.000000e+00 : f32
    %56 = vector.broadcast %cst_26 : f32 to vector<1x256xf32>
    %57 = arith.mulf %56, %8 : vector<1x256xf32>
    %cst_27 = arith.constant 1.000000e+00 : f32
    %58 = vector.broadcast %cst_27 : f32 to vector<1x256xf32>
    %59 = arith.subf %58, %57 : vector<1x256xf32>
    %60 = arith.mulf %55, %59 : vector<1x256xf32>
    %cst_28 = arith.constant 1.44530571 : f32
    %61 = vector.broadcast %cst_28 : f32 to vector<1x256xf32>
    %62 = arith.mulf %61, %2 : vector<1x256xf32>
    %63 = arith.subf %6, %7 : vector<1x256xf32>
    %64 = arith.mulf %62, %63 : vector<1x256xf32>
    %cst_29 = arith.constant -0.590043604 : f32
    %65 = vector.broadcast %cst_29 : f32 to vector<1x256xf32>
    %66 = arith.mulf %65, %0 : vector<1x256xf32>
    %cst_30 = arith.constant -3.000000e+00 : f32
    %67 = vector.broadcast %cst_30 : f32 to vector<1x256xf32>
    %68 = arith.mulf %67, %7 : vector<1x256xf32>
    %69 = arith.addf %68, %6 : vector<1x256xf32>
    %70 = arith.mulf %66, %69 : vector<1x256xf32>
    %c16 = arith.constant 16 : index
    %c0_31 = arith.constant 0 : index
    %71 = vector.load %arg8[%c16, %c0_31] : memref<32x256xf32, #tpu.memory_space<vmem>>, vector<1x256xf32>
    tpu.vector_store %arg8[%c16, %c0_31], %11 {strides = array<i32>} : memref<32x256xf32, #tpu.memory_space<vmem>>, vector<1x256xf32>,
    %c17 = arith.constant 17 : index
    %c0_32 = arith.constant 0 : index
    %72 = vector.load %arg8[%c17, %c0_32] : memref<32x256xf32, #tpu.memory_space<vmem>>, vector<1x256xf32>
    tpu.vector_store %arg8[%c17, %c0_32], %13 {strides = array<i32>} : memref<32x256xf32, #tpu.memory_space<vmem>>, vector<1x256xf32>,
    %c18 = arith.constant 18 : index
    %c0_33 = arith.constant 0 : index
    %73 = vector.load %arg8[%c18, %c0_33] : memref<32x256xf32, #tpu.memory_space<vmem>>, vector<1x256xf32>
    tpu.vector_store %arg8[%c18, %c0_33], %15 {strides = array<i32>} : memref<32x256xf32, #tpu.memory_space<vmem>>, vector<1x256xf32>,
    %c19 = arith.constant 19 : index
    %c0_34 = arith.constant 0 : index
    %74 = vector.load %arg8[%c19, %c0_34] : memref<32x256xf32, #tpu.memory_space<vmem>>, vector<1x256xf32>
    tpu.vector_store %arg8[%c19, %c0_34], %17 {strides = array<i32>} : memref<32x256xf32, #tpu.memory_space<vmem>>, vector<1x256xf32>,
    %c20 = arith.constant 20 : index
    %c0_35 = arith.constant 0 : index
    %75 = vector.load %arg8[%c20, %c0_35] : memref<32x256xf32, #tpu.memory_space<vmem>>, vector<1x256xf32>
    tpu.vector_store %arg8[%c20, %c0_35], %19 {strides = array<i32>} : memref<32x256xf32, #tpu.memory_space<vmem>>, vector<1x256xf32>,
    %c21 = arith.constant 21 : index
    %c0_36 = arith.constant 0 : index
    %76 = vector.load %arg8[%c21, %c0_36] : memref<32x256xf32, #tpu.memory_space<vmem>>, vector<1x256xf32>
    tpu.vector_store %arg8[%c21, %c0_36], %21 {strides = array<i32>} : memref<32x256xf32, #tpu.memory_space<vmem>>, vector<1x256xf32>,
    %c22 = arith.constant 22 : index
    %c0_37 = arith.constant 0 : index
    %77 = vector.load %arg8[%c22, %c0_37] : memref<32x256xf32, #tpu.memory_space<vmem>>, vector<1x256xf32>
    tpu.vector_store %arg8[%c22, %c0_37], %25 {strides = array<i32>} : memref<32x256xf32, #tpu.memory_space<vmem>>, vector<1x256xf32>,
    %c23 = arith.constant 23 : index
    %c0_38 = arith.constant 0 : index
    %78 = vector.load %arg8[%c23, %c0_38] : memref<32x256xf32, #tpu.memory_space<vmem>>, vector<1x256xf32>
    tpu.vector_store %arg8[%c23, %c0_38], %27 {strides = array<i32>} : memref<32x256xf32, #tpu.memory_space<vmem>>, vector<1x256xf32>,
    %c24 = arith.constant 24 : index
    %c0_39 = arith.constant 0 : index
    %79 = vector.load %arg8[%c24, %c0_39] : memref<32x256xf32, #tpu.memory_space<vmem>>, vector<1x256xf32>
    tpu.vector_store %arg8[%c24, %c0_39], %30 {strides = array<i32>} : memref<32x256xf32, #tpu.memory_space<vmem>>, vector<1x256xf32>,
    %c25 = arith.constant 25 : index
    %c0_40 = arith.constant 0 : index
    %80 = vector.load %arg8[%c25, %c0_40] : memref<32x256xf32, #tpu.memory_space<vmem>>, vector<1x256xf32>
    tpu.vector_store %arg8[%c25, %c0_40], %36 {strides = array<i32>} : memref<32x256xf32, #tpu.memory_space<vmem>>, vector<1x256xf32>,
    %c26 = arith.constant 26 : index
    %c0_41 = arith.constant 0 : index
    %81 = vector.load %arg8[%c26, %c0_41] : memref<32x256xf32, #tpu.memory_space<vmem>>, vector<1x256xf32>
    tpu.vector_store %arg8[%c26, %c0_41], %39 {strides = array<i32>} : memref<32x256xf32, #tpu.memory_space<vmem>>, vector<1x256xf32>,
    %c27 = arith.constant 27 : index
    %c0_42 = arith.constant 0 : index
    %82 = vector.load %arg8[%c27, %c0_42] : memref<32x256xf32, #tpu.memory_space<vmem>>, vector<1x256xf32>
    tpu.vector_store %arg8[%c27, %c0_42], %46 {strides = array<i32>} : memref<32x256xf32, #tpu.memory_space<vmem>>, vector<1x256xf32>,
    %c28 = arith.constant 28 : index
    %c0_43 = arith.constant 0 : index
    %83 = vector.load %arg8[%c28, %c0_43] : memref<32x256xf32, #tpu.memory_space<vmem>>, vector<1x256xf32>
    tpu.vector_store %arg8[%c28, %c0_43], %53 {strides = array<i32>} : memref<32x256xf32, #tpu.memory_space<vmem>>, vector<1x256xf32>,
    %c29 = arith.constant 29 : index
    %c0_44 = arith.constant 0 : index
    %84 = vector.load %arg8[%c29, %c0_44] : memref<32x256xf32, #tpu.memory_space<vmem>>, vector<1x256xf32>
    tpu.vector_store %arg8[%c29, %c0_44], %60 {strides = array<i32>} : memref<32x256xf32, #tpu.memory_space<vmem>>, vector<1x256xf32>,
    %c30 = arith.constant 30 : index
    %c0_45 = arith.constant 0 : index
    %85 = vector.load %arg8[%c30, %c0_45] : memref<32x256xf32, #tpu.memory_space<vmem>>, vector<1x256xf32>
    tpu.vector_store %arg8[%c30, %c0_45], %64 {strides = array<i32>} : memref<32x256xf32, #tpu.memory_space<vmem>>, vector<1x256xf32>,
    %c31 = arith.constant 31 : index
    %c0_46 = arith.constant 0 : index
    %86 = vector.load %arg8[%c31, %c0_46] : memref<32x256xf32, #tpu.memory_space<vmem>>, vector<1x256xf32>
    tpu.vector_store %arg8[%c31, %c0_46], %70 {strides = array<i32>} : memref<32x256xf32, #tpu.memory_space<vmem>>, vector<1x256xf32>,
    %c0_47 = arith.constant 0 : index
    %c0_48 = arith.constant 0 : index
    %87 = vector.load %arg6[%c0_47, %c0_48] : memref<128x8xf32, #tpu.memory_space<vmem>>, vector<128x8xf32>
    %88 = vector.extract_strided_slice %87 {offsets = [0, 0], sizes = [128, 1], strides = [1, 1]} : vector<128x8xf32> to vector<128x1xf32>
    %89 = vector.extract_strided_slice %87 {offsets = [0, 1], sizes = [128, 1], strides = [1, 1]} : vector<128x8xf32> to vector<128x1xf32>
    %90 = vector.extract_strided_slice %87 {offsets = [0, 2], sizes = [128, 1], strides = [1, 1]} : vector<128x8xf32> to vector<128x1xf32>
    %91 = vector.extract_strided_slice %87 {offsets = [0, 3], sizes = [1, 1], strides = [1, 1]} : vector<128x8xf32> to vector<1x1xf32>
    %c0_49 = arith.constant 0 : index
    %c0_50 = arith.constant 0 : index
    %92 = vector.load %arg4[%c0_49, %c0_50] : memref<128x32xbf16, #tpu.memory_space<vmem>>, vector<128x32xbf16>
    %c0_51 = arith.constant 0 : index
    %c0_52 = arith.constant 0 : index
    %93 = vector.load %arg8[%c0_51, %c0_52] : memref<32x256xf32, #tpu.memory_space<vmem>>, vector<32x256xf32>
    %94 = arith.truncf %93 : vector<32x256xf32> to vector<32x256xbf16>
    %cst_53 = arith.constant dense<0.000000e+00> : vector<128x256xf32>
    %95 = tpu.matmul %92, %94, %cst_53 {dimension_numbers = #tpu.dot_dimension_numbers<[1], [0], [0], [1], [0, 0, 1, 1], [], []>} : vector<128x32xbf16>, vector<32x256xbf16>, vector<128x256xf32> -> vector<128x256xf32>
    %96 = vector.broadcast %88 : vector<128x1xf32> to vector<128x256xf32>
    %97 = arith.addf %95, %96 : vector<128x256xf32>
    %cst_54 = arith.constant 0.000000e+00 : f32
    %98 = vector.broadcast %cst_54 : f32 to vector<128x256xf32>
    %99 = arith.maximumf %97, %98 : vector<128x256xf32>
    %c0_55 = arith.constant 0 : index
    %c0_56 = arith.constant 0 : index
    %100 = vector.load %arg5[%c0_55, %c0_56] : memref<128x128xbf16, #tpu.memory_space<vmem>>, vector<128x128xbf16>
    %101 = arith.truncf %99 : vector<128x256xf32> to vector<128x256xbf16>
    %cst_57 = arith.constant dense<0.000000e+00> : vector<128x256xf32>
    %102 = tpu.matmul %100, %101, %cst_57 {dimension_numbers = #tpu.dot_dimension_numbers<[1], [0], [0], [1], [0, 0, 1, 1], [], []>} : vector<128x128xbf16>, vector<128x256xbf16>, vector<128x256xf32> -> vector<128x256xf32>
    %103 = vector.broadcast %89 : vector<128x1xf32> to vector<128x256xf32>
    %104 = arith.addf %102, %103 : vector<128x256xf32>
    %cst_58 = arith.constant 0.000000e+00 : f32
    %105 = vector.broadcast %cst_58 : f32 to vector<128x256xf32>
    %106 = arith.maximumf %104, %105 : vector<128x256xf32>
    %107 = vector.broadcast %90 : vector<128x1xf32> to vector<128x256xf32>
    %108 = arith.mulf %107, %106 : vector<128x256xf32>
    %cst_59 = arith.constant dense<0.000000e+00> : vector<256xf32>
    %109 = vector.multi_reduction <add>, %108, %cst_59 [0] : vector<128x256xf32> to vector<256xf32>
    %110 = vector.shape_cast %109 : vector<256xf32> to vector<1x256xf32>
    %111 = vector.broadcast %91 : vector<1x1xf32> to vector<1x256xf32>
    %112 = arith.addf %110, %111 : vector<1x256xf32>
    %c0_60 = arith.constant 0 : index
    %c0_61 = arith.constant 0 : index
    %113 = vector.load %arg1[%c0_60, %c0_61] : memref<3x256xf32, #tpu.memory_space<vmem>>, vector<1x256xf32>
    %114 = arith.mulf %113, %0 : vector<1x256xf32>
    %c1_62 = arith.constant 1 : index
    %c0_63 = arith.constant 0 : index
    %115 = vector.load %arg1[%c1_62, %c0_63] : memref<3x256xf32, #tpu.memory_space<vmem>>, vector<1x256xf32>
    %116 = arith.mulf %115, %1 : vector<1x256xf32>
    %117 = arith.addf %114, %116 : vector<1x256xf32>
    %c2_64 = arith.constant 2 : index
    %c0_65 = arith.constant 0 : index
    %118 = vector.load %arg1[%c2_64, %c0_65] : memref<3x256xf32, #tpu.memory_space<vmem>>, vector<1x256xf32>
    %119 = arith.mulf %118, %2 : vector<1x256xf32>
    %120 = arith.addf %117, %119 : vector<1x256xf32>
    %cst_66 = arith.constant 9.99999997E-7 : f32
    %cst_67 = arith.constant 0.999998986 : f32
    %121 = vector.broadcast %cst_66 : f32 to vector<1x256xf32>
    %122 = arith.maximumf %121, %112 : vector<1x256xf32>
    %123 = vector.broadcast %cst_67 : f32 to vector<1x256xf32>
    %124 = arith.minimumf %123, %122 : vector<1x256xf32>
    %cst_68 = arith.constant 1.000000e+00 : f32
    %125 = vector.broadcast %cst_68 : f32 to vector<1x256xf32>
    %126 = arith.subf %125, %124 : vector<1x256xf32>
    %127 = arith.divf %124, %126 : vector<1x256xf32>
    %128 = math.log %127 : vector<1x256xf32>
    %129 = arith.subf %128, %120 : vector<1x256xf32>
    %c0_69 = arith.constant 0 : index
    %c0_70 = arith.constant 0 : index
    %130 = vector.load %arg7[%c0_69, %c0_70] : memref<2x256xf32, #tpu.memory_space<vmem>>, vector<1x256xf32>
    tpu.vector_store %arg7[%c0_69, %c0_70], %129 {strides = array<i32>} : memref<2x256xf32, #tpu.memory_space<vmem>>, vector<1x256xf32>,
    %c1_71 = arith.constant 1 : index
    %c0_72 = arith.constant 0 : index
    %131 = vector.load %arg7[%c1_71, %c0_72] : memref<2x256xf32, #tpu.memory_space<vmem>>, vector<1x256xf32>
    tpu.vector_store %arg7[%c1_71, %c0_72], %112 {strides = array<i32>} : memref<2x256xf32, #tpu.memory_space<vmem>>, vector<1x256xf32>,
    return
  }
  func.func @transform_0(%arg0: i32) -> (i32, i32) {
    %c0_i32 = arith.constant 0 : i32
    %c0_i32_0 = arith.constant 0 : i32
    return %c0_i32, %arg0 : i32, i32
  }
  func.func @transform_1(%arg0: i32) -> (i32, i32) {
    %c0_i32 = arith.constant 0 : i32
    %c0_i32_0 = arith.constant 0 : i32
    return %c0_i32, %arg0 : i32, i32
  }
  func.func @transform_2(%arg0: i32) -> (i32, i32) {
    %c0_i32 = arith.constant 0 : i32
    %c0_i32_0 = arith.constant 0 : i32
    return %c0_i32, %arg0 : i32, i32
  }
  func.func @transform_3(%arg0: i32) -> (i32, i32) {
    %c0_i32 = arith.constant 0 : i32
    %c0_i32_0 = arith.constant 0 : i32
    %c0_i32_1 = arith.constant 0 : i32
    return %c0_i32, %c0_i32_0 : i32, i32
  }
  func.func @transform_4(%arg0: i32) -> (i32, i32) {
    %c0_i32 = arith.constant 0 : i32
    %c0_i32_0 = arith.constant 0 : i32
    %c0_i32_1 = arith.constant 0 : i32
    return %c0_i32, %c0_i32_0 : i32, i32
  }
  func.func @transform_5(%arg0: i32) -> (i32, i32) {
    %c0_i32 = arith.constant 0 : i32
    %c0_i32_0 = arith.constant 0 : i32
    %c0_i32_1 = arith.constant 0 : i32
    return %c0_i32, %c0_i32_0 : i32, i32
  }
  func.func @transform_6(%arg0: i32) -> (i32, i32) {
    %c0_i32 = arith.constant 0 : i32
    %c0_i32_0 = arith.constant 0 : i32
    return %c0_i32, %arg0 : i32, i32
  }
}

</mosaic_0001>

<bundles_post_ra>
// kernel: tpu_custom_call.1
= control target key start
LH: loop header
LB: loop body
LE: loop exit
PB: predicated region body
PF: predicated region fallthrough
CT: control target
= control target key end

     0   :  { %11 = vsyncpa [#allocation5], 0  ;;  %s2068_s0 = inlined_call_operand.vmem [shape: f32[3,512], index: 0, kind: input, shape index: {}]   ;;  %s2069_s1 = inlined_call_operand.vmem [shape: f32[3,512], index: 1, kind: input, shape index: {}]   ;;  %s2070_s2 = inlined_call_operand.vmem [shape: f32[16,512], index: 2, kind: input, shape index: {}]   ;;  %s2071_s3 = inlined_call_operand.vmem [shape: bf16[128,32], index: 3, kind: input, shape index: {}]   ;;  %s2072_s4 = inlined_call_operand.vmem [shape: bf16[128,128], index: 4, kind: input, shape index: {}]   ;;  %s2073_s5 = inlined_call_operand.vmem [shape: f32[128,8], index: 5, kind: input, shape index: {}]   ;;  %s2074_s6 = inlined_call_operand.hbm [shape: f32[2,512], index: 6, kind: output, shape index: {}]  }
   0x1   :  { %13 = vsyncpa [#allocation5 + $0x1], 0  ;;  %s1635_s21 = smov 0   ;;  %s1637_s22 = smov 0  }
   0x2   :  { %s1639_s23 = smov 0   ;;  %s1641_s24 = smov 0  }
   0x3 LB: > { %s1656_s25 = sadd.s32 4294967295, %s1591_s24   ;;  %s1372_s26 = sadd.s32 4294967294, %s1591_s24   ;;  %s1591_s24 = sphi %s1641_s24, %s2082_s24   ;;  %s1587_s23 = sphi %s1639_s23, %s2081_s23   ;;  %s1583_s22 = sphi %s1637_s22, %s2080_s22   ;;  %s1579_s21 = sphi %s1635_s21, %s2079_s21  }
   0x4   : > { %s1660_s27 = sadd.s32 1, %s1591_s24   ;;  %s78_s28 = sadd.s32 1, %s1587_s23 }
   0x5   : > { %s75_s29 = ssub.s32 %s1591_s24, %s1660_s27  ;;  %p85_p0 = scmp.ne.s32.totalorder %s1587_s23, %s1583_s22 }
   0x6   : > { %p76_p1 = scmp.eq.s32.totalorder %s75_s29, 0  ;;  %p86_p2 = scmp.eq.s32.totalorder %s1591_s24, 0 }
   0x7   : > { %p178_p3 = scmp.eq.s32.totalorder %s1656_s25, 1  ;;  %p183_p4 = scmp.ne.s32.totalorder %s1583_s22, %s1579_s21 }
   0x8   : > { %s1672_s30 = scalar_select %p76_p1, %s1587_s23, %s78_s28  }
   0x9   : > { %p87_p5 = por %p86_p2, %p85_p0  ;;  %p1674_p6 = por %p178_p3, %p85_p0 }
   0xa   : > { %p184_p7 = scmp.eq.s32.totalorder %s1372_s26, 1  ;;  %p1374_p9 = scmp.ge.s32.totalorder %s1591_s24, 2 }
   0xc   : > { %p1678_p8 = por %p184_p7, %p183_p4  ;;  %209 = sbr.rel (%p1374_p9) target bundleno = 26 (0x1a), region = 28 }
  0x13   : > { %230 = sbr.rel (!%p87_p5) target bundleno = 26 (0x1a), region = 40  ;;  %s232_s9 = sand.u32 (%p87_p5), 1, %s1587_s23  }
  0x14   : > { %s1421_s10 = sshll.u32 (%p87_p5), %s1591_s24, 4  ;;  %s1375_s11 = sshll.u32 (%p87_p5), %s232_s9, 5 }
  0x15   : > { %s237_s14 = scalar_lea.vmem (%p87_p5), %s2070_s2, %s1421_s10  ;;  %s234_s15 = scalar_lea.vmem (%p87_p5), [#allocation3], %s1375_s11 }
  0x16   : > { %v250_v0 = vld [vmem:[%s237_s14] sm:$0xff] (%p87_p5)  ;;  %v252_v1 = vld [vmem:[%s237_s14 + $0x8] sm:$0xff] (%p87_p5) }
  0x17   : > { %v254_v2 = vld [vmem:[%s237_s14 + $0x20] sm:$0xff] (%p87_p5)  ;;  %251 = vst [vmem:[%s234_s15] sm:$0xff] (%p87_p5), %v250_v0  ;;  %253 = vst [vmem:[%s234_s15 + $0x8] sm:$0xff] (%p87_p5), %v252_v1  ;;  %v256_v3 = vld [vmem:[%s237_s14 + $0x28] sm:$0xff] (%p87_p5) }
  0x18   : > { %255 = vst [vmem:[%s234_s15 + $0x10] sm:$0xff] (%p87_p5), %v254_v2  ;;  %257 = vst [vmem:[%s234_s15 + $0x18] sm:$0xff] (%p87_p5), %v256_v3 }
  0x1a PF: > { %p1378_p10 = scmp.ge.s32.totalorder %s1591_s24, 1  ;;  %p262_p11 = scmp.lt.s32.totalorder %s1591_s24, 3 }
  0x1c   : > { %p263_p12 = pnand %p1378_p10, %p262_p11 }
  0x1d   : > { %s1693_s16 = sand.u32 (!%p263_p12), 1, %s1583_s22   ;;  %s1381_s17 = sshll.u32 (!%p263_p12), %s1656_s25, 1  ;;  %v373_v4 = vlaneseq (!%p263_p12)  ;;  %v1593_v5 = vmov (!%p263_p12), 0   ;;  %v1594_v10 = vmov (!%p263_p12), 0.2820948   ;;  %v1742_v52 = vld [vmem:[%s2073_s5] sm:$0xff] (!%p263_p12) }
  0x1e   : > { %266 = sbr.rel (%p263_p12) target bundleno = 690 (0x2b2), region = 63  ;;  %s1379_s18 = sshll.u32 (!%p263_p12), %s1693_s16, 5  ;;  %646 = vmatprep.mubr.bf16.mxu0 (!%p263_p12), %v1593_v5  ;;  %1484 = vset.pattern.permute.xlu0 (!%p263_p12), %v1593_v5  ;;  %v1754_v54 = vld [vmem:[%s2073_s5 + $0x10] sm:$0xff] (!%p263_p12)  ;;  %v1763_v55 = vld [vmem:[%s2073_s5 + $0x8] sm:$0xff] (!%p263_p12)  ;;  %v1769_v57 = vld [vmem:[%s2073_s5 + $0x18] sm:$0xff] (!%p263_p12)  ;;  %vm589_vm1 = vcmask (!%p263_p12), 261120  }
  0x1f   : > { %p309_p13 = scmp.lt.s32.totalorder (!%p263_p12), %s1381_s17, 3  ;;  %vm1700_vm0 = vcmp.lt.s32.totalorder (!%p263_p12), %v373_v4, 256  ;;  %1485 = vset.pattern.permute.xlu1 (!%p263_p12), %v1593_v5  ;;  %945 = vmatprep.mubr.bf16.mxu1 (!%p263_p12), %v1593_v5  ;;  %s271_s19 = scalar_lea.vmem (!%p263_p12), [#allocation3], %s1379_s18  ;;  %v1777_v58 = vld [vmem:[%s2073_s5 + $0x20] sm:$0xff] (!%p263_p12)  ;;  %v1783_v59 = vld [vmem:[%s2073_s5 + $0x28] sm:$0xff] (!%p263_p12)  ;;  %v1788_v62 = vld [vmem:[%s2073_s5 + $0x30] sm:$0xff] (!%p263_p12) }
  0x20   : > { %v335_v7 = vld [vmem:[%s271_s19 + $0x8] sm:$0xff] (!%p263_p12)  ;;  %v337_v8 = vld [vmem:[%s271_s19 + $0x18] sm:$0xff] (!%p263_p12)  ;;  %v334_v9 = vld [vmem:[%s271_s19] sm:$0xff] (!%p263_p12)  ;;  %378 = vst.msk [vmem:[#allocation2 + $0x20] ss:$8 sm:$0x3] (!%p263_p12), %vm1700_vm0, %v1594_v10  ;;  %471 = vperm.xlu0 (!%p263_p12), %1484, %v1742_v52   ;;  %481 = vperm.xlu1 (!%p263_p12), %1485, %v1754_v54  }
  0x21   : > { %v466_v11 = vpack.c.bf16 (!%p263_p12), %v337_v8, %v335_v7  ;;  %v336_v12 = vld [vmem:[%s271_s19 + $0x10] sm:$0xff] (!%p263_p12)  ;;  %v1794_v63 = vld [vmem:[%s2073_s5 + $0x38] sm:$0xff] (!%p263_p12)  ;;  %v1801_v7 = vld [vmem:[%s2073_s5 + $0x40] sm:$0xff] (!%p263_p12)  ;;  %s1380_s26 = sshll.u32 (!%p263_p12), %s1693_s16, 2  ;;  %s1269_s14 = scalar_lea.sflag (!%p263_p12), [#allocation5], %s1693_s16 }
  0x22   : > { %v465_v13 = vpack.c.bf16 (!%p263_p12), %v336_v12, %v334_v9  ;;  %v1502_v8 = vld [vmem:[%s2071_s3] sm:$0xff] (!%p263_p12)   ;;  %v1810_v9 = vld [vmem:[%s2073_s5 + $0x48] sm:$0xff] (!%p263_p12)  ;;  %v1816_v10 = vld [vmem:[%s2073_s5 + $0x50] sm:$0xff] (!%p263_p12)  ;;  %s2003_s28 = scalar_lea.vmem (!%p263_p12), [#allocation4], %s1380_s26 }
  0x23   : > { %614 = vmatprep.subr.bf16.mxu0 (!%p263_p12), %v466_v11  ;;  %v1823_v11 = vld [vmem:[%s2073_s5 + $0x58] sm:$0xff] (!%p263_p12)  ;;  %v1830_v12 = vld [vmem:[%s2073_s5 + $0x60] sm:$0xff] (!%p263_p12) }
  0x24   : > { %615 = vmatpush1.bf16.msra.mxu0 (!%p263_p12), %v465_v13  ;;  %476 = vperm.xlu0 (!%p263_p12), %1484, %v1763_v55   ;;  %v1503_v13 = vld [vmem:[%s2071_s3 + $0x8] sm:$0xff] (!%p263_p12)  }
  0x25   : > { %s2084_s17 = smov (!%p309_p13, %s1381_s17), 3  ;;  %486 = vperm.xlu1 %1485, %v1769_v57  }
  0x26   : > { %s1382_s20 = sshll.u32 %s2084_s17, 2  ;;  %s1422_s17 = sshll.u32 %s1656_s25, 6 }
  0x27   : > { %s1716_s29 = scalar_lea.vmem %s2069_s1, %s1382_s20  ;;  %s312_s11 = scalar_lea.vmem %s2068_s0, %s1382_s20 }
  0x28   : > { %v323_v14 = vld [vmem:[%s1716_s29] ss:$4 sm:$0x3]  ;;  %v1385_v15 = vld [vmem:[%s1716_s29 + $0x1] ss:$4 sm:$0x3]  ;;  %491 = vperm.xlu0 %1484, %v1777_v58   ;;  %s2021_s13 = scalar_lea.hbm %s2074_s6, %s1422_s17 }
  0x29   : > { %v1386_v16 = vld [vmem:[%s1716_s29 + $0x2] ss:$4 sm:$0x3]  ;;  %v328_v17 = vmul.f32 %v1385_v15, %v323_v14  ;;  %v331_v18 = vmul.f32 %v323_v14, %v323_v14  ;;  %v332_v19 = vmul.f32 %v1385_v15, %v1385_v15  ;;  %v342_v20 = vmul.f32 -0.48860252, %v1385_v15  ;;  %496 = vperm.xlu1 %1485, %v1783_v59   ;;  %s1283_s20 = sshll.u32 %s2003_s28, 4  ;;  %s2023_s20 = int_to_ptr.vmem [resolvable:$true] %s1283_s20 }
  0x2a   : > { %v329_v21 = vmul.f32 %v1386_v16, %v323_v14  ;;  %v330_v22 = vmul.f32 %v1386_v16, %v1385_v15  ;;  %v333_v23 = vmul.f32 %v1386_v16, %v1386_v16  ;;  %v343_v24 = vmul.f32 0.48860252, %v1386_v16  ;;  %s1529_s15 = scalar_lea.vmem %s2023_s20, 64  ;;  %s1599_s25 = smov [#allocation4]  }
  0x2b   : > { %v344_v25 = vmul.f32 -0.48860252, %v323_v14  ;;  %v345_v26 = vmul.f32 1.0925485, %v328_v17  ;;  %v350_v27 = vsub.f32 %v331_v18, %v332_v19  ;;  %v352_v28 = vmul.f32 0.5900436, %v1385_v15  ;;  %p1530_p0 = scmp.ne.s32.totalorder %s2023_s20, %s1529_s15 }
  0x2c   : > { %381 = vst.msk [vmem:[#allocation2 + $0x21] ss:$8 sm:$0x3] %vm1700_vm0, %v342_v20  ;;  %v346_v29 = vmul.f32 -1.0925485, %v330_v22  ;;  %v353_v33 = vmul.f32 -3.0, %v331_v18  ;;  %501 = vperm.xlu0 %1484, %v1788_v62  }
  0x2d   : > { %v347_v30 = vmul.f32 0.9461747, %v333_v23  ;;  %v349_v31 = vmul.f32 -1.0925485, %v329_v21  ;;  %v351_v32 = vmul.f32 0.54627424, %v350_v27  ;;  %506 = vperm.xlu1 %1485, %v1794_v63   ;;  %p1531_p1 = pnand %p1530_p0, %p1674_p6 }
  0x2e   : > { %384 = vst.msk [vmem:[#allocation2 + $0x22] ss:$8 sm:$0x3] %vm1700_vm0, %v343_v24  ;;  %v356_v34 = vmul.f32 2.8906114, %v328_v17  ;;  %v359_v35 = vmul.f32 5.0, %v333_v23  ;;  %v354_v39 = vadd.f32 %v353_v33, %v332_v19 }
  0x2f   : > { %387 = vst.msk [vmem:[#allocation2 + $0x23] ss:$8 sm:$0x3] %vm1700_vm0, %v344_v25  ;;  %390 = vst.msk [vmem:[#allocation2 + $0x24] ss:$8 sm:$0x3] %vm1700_vm0, %v345_v26  ;;  %p1532_p2 = pneg %p1531_p1 }
  0x30   : > { %v1387_v36 = vadd.f32 -0.31539157, %v347_v30  ;;  %v358_v37 = vmul.f32 0.4570458, %v1385_v15  ;;  %v362_v38 = vmul.f32 0.37317634, %v1386_v16  ;;  %v357_v40 = vmul.f32 %v1386_v16, %v356_v34  ;;  %511 = vperm.xlu0 %1484, %v1801_v7  }
  0x31   : > { %393 = vst.msk [vmem:[#allocation2 + $0x25] ss:$8 sm:$0x3] %vm1700_vm0, %v346_v29  ;;  %399 = vst.msk [vmem:[#allocation2 + $0x27] ss:$8 sm:$0x3] %vm1700_vm0, %v349_v31  ;;  %v355_v46 = vmul.f32 %v354_v39, %v352_v28  ;;  %516 = vperm.xlu1 %1485, %v1810_v9  }
  0x32   : > { %v360_v41 = vsub.f32 1.0, %v359_v35  ;;  %v1388_v42 = vadd.f32 -3.0, %v359_v35  ;;  %402 = vst.msk [vmem:[#allocation2 + $0x30] ss:$8 sm:$0x3] %vm1700_vm0, %v351_v32  ;;  %v370_v49 = vmul.f32 -3.0, %v332_v19 }
  0x33   : > { %v365_v43 = vmul.f32 0.4570458, %v323_v14  ;;  %v367_v44 = vmul.f32 1.4453057, %v1386_v16  ;;  %v369_v45 = vmul.f32 -0.5900436, %v323_v14 }
  0x34   : > { %396 = vst.msk [vmem:[#allocation2 + $0x26] ss:$8 sm:$0x3] %vm1700_vm0, %v1387_v36  ;;  %v361_v47 = vmul.f32 %v360_v41, %v358_v37  ;;  %v364_v48 = vmul.f32 %v1388_v42, %v362_v38  ;;  %408 = vst.msk [vmem:[#allocation2 + $0x32] ss:$8 sm:$0x3] %vm1700_vm0, %v357_v40  ;;  %v371_v53 = vadd.f32 %v370_v49, %v331_v18  ;;  %521 = vperm.xlu0 %1484, %v1816_v10  }
  0x35   : > { %v366_v50 = vmul.f32 %v365_v43, %v360_v41  ;;  %v368_v51 = vmul.f32 %v367_v44, %v350_v27  ;;  %405 = vst.msk [vmem:[#allocation2 + $0x31] ss:$8 sm:$0x3] %vm1700_vm0, %v355_v46  ;;  %526 = vperm.xlu1 %1485, %v1823_v11   ;;  %v1839_v14 = vld [vmem:[%s2073_s5 + $0x68] sm:$0xff]  ;;  %v1845_v15 = vld [vmem:[%s2073_s5 + $0x70] sm:$0xff]  ;;  %v1852_v16 = vld [vmem:[%s2073_s5 + $0x78] sm:$0xff] }
  0x36   : > { %411 = vst.msk [vmem:[#allocation2 + $0x33] ss:$8 sm:$0x3] %vm1700_vm0, %v361_v47  ;;  %414 = vst.msk [vmem:[#allocation2 + $0x34] ss:$8 sm:$0x3] %vm1700_vm0, %v364_v48  ;;  %v372_v56 = vmul.f32 %v371_v53, %v369_v45 }
  0x37   : > { %417 = vst.msk [vmem:[#allocation2 + $0x35] ss:$8 sm:$0x3] %vm1700_vm0, %v366_v50  ;;  %420 = vst.msk [vmem:[#allocation2 + $0x36] ss:$8 sm:$0x3] %vm1700_vm0, %v368_v51 }
  0x38   : > { %423 = vst.msk [vmem:[#allocation2 + $0x37] ss:$8 sm:$0x3] %vm1700_vm0, %v372_v56  ;;  %531 = vperm.xlu0 %1484, %v1830_v12   ;;  %v1504_v17 = vld [vmem:[%s2071_s3 + $0x10] sm:$0xff]   ;;  %v1505_v18 = vld [vmem:[%s2071_s3 + $0x18] sm:$0xff]   ;;  %v1506_v19 = vld [vmem:[%s2071_s3 + $0x20] sm:$0xff]  }
  0x39   : > { %536 = vperm.xlu1 %1485, %v1839_v14   ;;  %v1507_v20 = vld [vmem:[%s2071_s3 + $0x28] sm:$0xff]   ;;  %v1508_v21 = vld [vmem:[%s2071_s3 + $0x30] sm:$0xff]   ;;  %v1509_v22 = vld [vmem:[%s2071_s3 + $0x38] sm:$0xff]   ;;  %v1595_v23 = vmov 1   ;;  %v1596_v24 = vmov 2   ;;  %s1533_s18 = sshll.u32 %s1599_s25, 4  ;;  %s1534_s18 = int_to_ptr.vmem [resolvable:$false] %s1533_s18 }
  0x3a   : > { %s1535_s19 = scalar_lea.vmem %s1534_s18, 128  ;;  %p1536_p3 = scmp.lt.s32.totalorder %s2023_s20, %s1534_s18 }
  0x3b   : > { %v462_v60 = vld [vmem:[#allocation2 + $0x28] sm:$0xff]  ;;  %v461_v61 = vld [vmem:[#allocation2 + $0x20] sm:$0xff]  ;;  %p1537_p4 = scmp.lt.s32.totalorder %s1535_s19, %s1529_s15 }
  0x3c   : > { %541 = vperm.xlu0 %1484, %v1845_v15  }
  0x3d   : > { %546 = vperm.xlu1 %1485, %v1852_v16   ;;  %p1538_p5 = por %p1537_p4, %p1536_p3 }
  0x3f   : > { %v464_v0 = vld [vmem:[#allocation2 + $0x38] sm:$0xff]  ;;  %v463_v1 = vld [vmem:[#allocation2 + $0x30] sm:$0xff]  ;;  %p1539_p7 = pnand %p1538_p5, %p1532_p2 }
  0x40   : > { %v468_v2 = vpack.c.bf16 %v464_v0, %v462_v60  ;;  %v467_v3 = vpack.c.bf16 %v463_v1, %v461_v61  ;;  %1488 = vset.pattern.permute.xlu0 %v1596_v24 }
  0x41   : > { %1486 = vset.pattern.permute.xlu1 %v1595_v23  ;;  %1053 = vperm.xlu0 %1488, %v1763_v55  }
  0x42   : > { %616 = vmatprep.subr.bf16.mxu0 %v468_v2  ;;  %796 = vperm.xlu1 %1486, %v1763_v55  }
  0x43   : > { %617 = vmatpush1.bf16.msra.mxu0 %v467_v3 }
  0x45   : > { %1065 = vperm.xlu0 %1488, %v1777_v58  }
  0x46   : > { %1397 = vmatmul.mubr.msk.bf16.vlgmr.msra.gmra.mrb[0].mxu0 %vm589_vm1, %v1502_v8  ;;  %800 = vperm.xlu1 %1486, %v1754_v54  }
  0x47   : > { %656 = vmatprep.mubr.bf16.mxu0 %v1593_v5 }
  0x49   : > { %1077 = vperm.xlu0 %1488, %v1794_v63  }
  0x4a   : > { %1487 = vset.pattern.permute.xlu1 %v1596_v24 }
  0x4b   : > { %1049 = vperm.xlu1 %1487, %v1742_v52  }
  0x4d   : > { %1089 = vperm.xlu0 %1488, %v1816_v10  }
  0x4e   : > { %1398 = vmatmul.mubr.msk.bf16.gmra.mrb[4].mxu0 %vm589_vm1, %v1503_v13 }
  0x4f   : > { %666 = vmatprep.mubr.bf16.mxu0 %v1593_v5  ;;  %1489 = vset.pattern.permute.xlu1 %v1595_v23 }
  0x50   : > { %808 = vperm.xlu1 %1489, %v1777_v58  }
  0x51   : > { %1496 = vset.pattern.permute.xlu0 %v1595_v23 }
  0x52   : > { %792 = vperm.xlu0 %1496, %v1742_v52  }
  0x54   : > { %1490 = vset.pattern.permute.xlu1 %v1596_v24 }
  0x55   : > { %1057 = vperm.xlu1 %1490, %v1754_v54  }
  0x56   : > { %1399 = vmatmul.mubr.msk.bf16.gmra.mrb[8].mxu0 %vm589_vm1, %v1504_v17  ;;  %804 = vperm.xlu0 %1496, %v1769_v57  }
  0x57   : > { %676 = vmatprep.mubr.bf16.mxu0 %v1593_v5 }
  0x59   : > { %1061 = vperm.xlu1 %1490, %v1769_v57  }
  0x5a   : > { %812 = vperm.xlu0 %1496, %v1783_v59  }
  0x5d   : > { %1491 = vset.pattern.permute.xlu1 %v1595_v23 }
  0x5e   : > { %1400 = vmatmul.mubr.msk.bf16.gmra.mrb[12].mxu0 %vm589_vm1, %v1505_v18  ;;  %816 = vperm.xlu1 %1491, %v1788_v62  }
  0x5f   : > { %686 = vmatprep.mubr.bf16.mxu0 %v1593_v5  ;;  %824 = vperm.xlu0 %1496, %v1801_v7  }
  0x62   : > { %820 = vperm.xlu1 %1491, %v1794_v63  }
  0x63   : > { %836 = vperm.xlu0 %1496, %v1823_v11  }
  0x66   : > { %1401 = vmatmul.mubr.msk.bf16.gmra.mrb[16].mxu0 %vm589_vm1, %v1506_v19  ;;  %1492 = vset.pattern.permute.xlu1 %v1596_v24 }
  0x67   : > { %696 = vmatprep.mubr.bf16.mxu0 %v1593_v5  ;;  %1069 = vperm.xlu1 %1492, %v1783_v59  }
  0x68   : > { %848 = vperm.xlu0 %1496, %v1845_v15  }
  0x6b   : > { %1073 = vperm.xlu1 %1492, %v1788_v62  }
  0x6c   : > { %1499 = vset.pattern.permute.xlu0 %v1596_v24 }
  0x6d   : > { %1101 = vperm.xlu0 %1499, %v1839_v14  }
  0x6e   : > { %1402 = vmatmul.mubr.msk.bf16.gmra.mrb[20].mxu0 %vm589_vm1, %v1507_v20 }
  0x6f   : > { %706 = vmatprep.mubr.bf16.mxu0 %v1593_v5  ;;  %1493 = vset.pattern.permute.xlu1 %v1595_v23 }
  0x70   : > { %828 = vperm.xlu1 %1493, %v1810_v9  }
  0x74   : > { %832 = vperm.xlu1 %1493, %v1816_v10  }
  0x76   : > { %1403 = vmatmul.mubr.msk.bf16.gmra.mrb[24].mxu0 %vm589_vm1, %v1508_v21 }
  0x77   : > { %716 = vmatprep.mubr.bf16.mxu0 %v1593_v5 }
  0x78   : > { %1494 = vset.pattern.permute.xlu1 %v1596_v24 }
  0x79   : > { %1081 = vperm.xlu1 %1494, %v1801_v7  }
  0x7d   : > { %1085 = vperm.xlu1 %1494, %v1810_v9  }
  0x7e   : > { %1404 = vmatmul.mubr.msk.bf16.gmra.mrb[28].mxu0 %vm589_vm1, %v1509_v22 }
  0x7f   : > { %935 = vmatprep.mubr.bf16.mxu0 %v1593_v5 }
  0x81   : > { %1495 = vset.pattern.permute.xlu1 %v1595_v23 }
  0x82   : > { %840 = vperm.xlu1 %1495, %v1830_v12  }
  0x86   : > { %844 = vperm.xlu1 %1495, %v1839_v14  }
  0x8a   : > { %1497 = vset.pattern.permute.xlu1 %v1596_v24 }
  0x8b   : > { %1093 = vperm.xlu1 %1497, %v1823_v11   ;;  %v1512_v11 = vld [vmem:[%s2072_s4 + $0x10] sm:$0xff]  }
  0x8f   : > { %1097 = vperm.xlu1 %1497, %v1830_v12   ;;  %v1513_v12 = vld [vmem:[%s2072_s4 + $0x18] sm:$0xff]  }
  0x93   : > { %1498 = vset.pattern.permute.xlu1 %v1595_v23  ;;  %v1514_v23 = vld [vmem:[%s2072_s4 + $0x20] sm:$0xff]  }
  0x94   : > { %852 = vperm.xlu1 %1498, %v1852_v16  }
  0x98   : > { %1500 = vset.pattern.permute.xlu1 %v1596_v24  ;;  %v1517_v24 = vld [vmem:[%s2072_s4 + $0x38] sm:$0xff]  }
  0x99   : > { %1105 = vperm.xlu1 %1500, %v1845_v15   ;;  %v1515_v15 = vld [vmem:[%s2072_s4 + $0x28] sm:$0xff]  }
  0x9d   : > { %1109 = vperm.xlu1 %1500, %v1852_v16   ;;  %v1516_v16 = vld [vmem:[%s2072_s4 + $0x30] sm:$0xff]  }
  0x9f   : > { %v472_v25 = vpop.permute.xlu0 %471  ;;  %v482_v34 = vpop.permute.xlu1 %481 }
  0xa3   : > { %v477_v26 = vpop.permute.xlu0 %476 }
  0xa4   : > { %v487_v45 = vpop.permute.xlu1 %486 }
  0xa7   : > { %v492_v58 = vpop.permute.xlu0 %491 }
  0xa8   : > { %v497_v2 = vpop.permute.xlu1 %496 }
  0xab   : > { %v502_v22 = vpop.permute.xlu0 %501 }
 0x119   : > { %v648_v27 = vpop.f32.mrb[0].mxu0 }
 0x11a   : > { %v649_v28 = vadd.f32 %v648_v27, %v472_v25  ;;  %v650_v29 = vpop.f32.mrb[1].mxu0 }
 0x11b   : > { %v651_v30 = vadd.f32 %v650_v29, %v472_v25  ;;  %v652_v31 = vpop.f32.mrb[2].mxu0  ;;  %v507_v29 = vpop.permute.xlu1 %506 }
 0x11c   : > { %v653_v32 = vadd.f32 %v652_v31, %v477_v26  ;;  %v654_v33 = vpop.f32.mrb[3].mxu0  ;;  %v727_v36 = vmax.f32 %v649_v28, 0.0 }
 0x11d   : > { %v655_v35 = vadd.f32 %v654_v33, %v477_v26  ;;  %v728_v38 = vmax.f32 %v651_v30, 0.0 }
 0x11e   : > { %v729_v37 = vmax.f32 %v653_v32, 0.0 }
 0x11f   : > { %v730_v39 = vmax.f32 %v655_v35, 0.0 }
 0x120   : > { %v775_v40 = vpack.c.bf16 %v729_v37, %v727_v36 }
 0x121   : > { %v776_v41 = vpack.c.bf16 %v730_v39, %v728_v38  ;;  %v658_v42 = vpop.f32.mrb[4].mxu0  ;;  %v512_v39 = vpop.permute.xlu0 %511 }
 0x122   : > { %v659_v43 = vadd.f32 %v658_v42, %v482_v34  ;;  %v660_v44 = vpop.f32.mrb[5].mxu0 }
 0x123   : > { %v661_v46 = vadd.f32 %v660_v44, %v482_v34  ;;  %v662_v47 = vpop.f32.mrb[6].mxu0  ;;  %903 = vmatprep.subr.bf16.mxu0 %v776_v41  ;;  %1423 = vmatprep.subr.bf16.mxu1 %v776_v41  ;;  %v517_v44 = vpop.permute.xlu1 %516 }
 0x124   : > { %v663_v48 = vadd.f32 %v662_v47, %v487_v45  ;;  %v664_v49 = vpop.f32.mrb[7].mxu0  ;;  %904 = vmatpush1.bf16.msra.mxu0 %v775_v40  ;;  %1431 = vmatpush1.bf16.msra.mxu1 %v775_v40  ;;  %v731_v51 = vmax.f32 %v659_v43, 0.0 }
 0x125   : > { %v665_v50 = vadd.f32 %v664_v49, %v487_v45  ;;  %v732_v54 = vmax.f32 %v661_v46, 0.0 }
 0x126   : > { %v733_v53 = vmax.f32 %v663_v48, 0.0 }
 0x127   : > { %v734_v55 = vmax.f32 %v665_v50, 0.0 }
 0x128   : > { %v777_v56 = vpack.c.bf16 %v733_v53, %v731_v51 }
 0x129   : > { %v778_v60 = vpack.c.bf16 %v734_v55, %v732_v54  ;;  %v668_v61 = vpop.f32.mrb[8].mxu0  ;;  %v522_v55 = vpop.permute.xlu0 %521 }
 0x12a   : > { %v669_v0 = vadd.f32 %v668_v61, %v492_v58  ;;  %v670_v1 = vpop.f32.mrb[9].mxu0 }
 0x12b   : > { %v671_v3 = vadd.f32 %v670_v1, %v492_v58  ;;  %v672_v8 = vpop.f32.mrb[10].mxu0  ;;  %905 = vmatprep.subr.bf16.mxu0 %v778_v60  ;;  %1424 = vmatprep.subr.bf16.mxu1 %v778_v60  ;;  %v1597_v60 = vmov 3   ;;  %v527_v1 = vpop.permute.xlu1 %526 }
 0x12c   : > { %v673_v13 = vadd.f32 %v672_v8, %v497_v2  ;;  %v674_v17 = vpop.f32.mrb[11].mxu0  ;;  %906 = vmatpush1.bf16.msra.mxu0 %v777_v56  ;;  %1432 = vmatpush1.bf16.msra.mxu1 %v777_v56  ;;  %v735_v18 = vmax.f32 %v669_v0, 0.0 }
 0x12d   : > { %v675_v57 = vadd.f32 %v674_v17, %v497_v2  ;;  %v736_v20 = vmax.f32 %v671_v3, 0.0  ;;  %1501 = vset.pattern.permute.xlu0 %v1597_v60 }
 0x12e   : > { %v737_v19 = vmax.f32 %v673_v13, 0.0  ;;  %1187 = vperm.xlu0 %1501, %v1742_v52  }
 0x12f   : > { %v738_v63 = vmax.f32 %v675_v57, 0.0 }
 0x130   : > { %v779_v21 = vpack.c.bf16 %v737_v19, %v735_v18 }
 0x131   : > { %v780_v25 = vpack.c.bf16 %v738_v63, %v736_v20  ;;  %v678_v26 = vpop.f32.mrb[12].mxu0  ;;  %v532_v63 = vpop.permute.xlu0 %531 }
 0x132   : > { %v679_v27 = vadd.f32 %v678_v26, %v502_v22  ;;  %v680_v28 = vpop.f32.mrb[13].mxu0  ;;  %v537_v26 = vpop.permute.xlu1 %536 }
 0x133   : > { %v681_v30 = vadd.f32 %v680_v28, %v502_v22  ;;  %v682_v31 = vpop.f32.mrb[14].mxu0  ;;  %907 = vmatprep.subr.bf16.mxu0 %v780_v25  ;;  %1425 = vmatprep.subr.bf16.mxu1 %v780_v25 }
 0x134   : > { %v683_v32 = vadd.f32 %v682_v31, %v507_v29  ;;  %v684_v33 = vpop.f32.mrb[15].mxu0  ;;  %908 = vmatpush1.bf16.msra.mxu0 %v779_v21  ;;  %1433 = vmatpush1.bf16.msra.mxu1 %v779_v21  ;;  %v739_v59 = vmax.f32 %v679_v27, 0.0 }
 0x135   : > { %v685_v34 = vadd.f32 %v684_v33, %v507_v29  ;;  %v740_v36 = vmax.f32 %v681_v30, 0.0 }
 0x136   : > { %v741_v35 = vmax.f32 %v683_v32, 0.0 }
 0x137   : > { %v742_v37 = vmax.f32 %v685_v34, 0.0 }
 0x138   : > { %v781_v38 = vpack.c.bf16 %v741_v35, %v739_v59  ;;  %v542_v59 = vpop.permute.xlu0 %541 }
 0x139   : > { %v782_v40 = vpack.c.bf16 %v742_v37, %v740_v36  ;;  %v688_v41 = vpop.f32.mrb[16].mxu0 }
 0x13a   : > { %v689_v42 = vadd.f32 %v688_v41, %v512_v39  ;;  %v690_v43 = vpop.f32.mrb[17].mxu0 }
 0x13b   : > { %v691_v62 = vadd.f32 %v690_v43, %v512_v39  ;;  %v692_v45 = vpop.f32.mrb[18].mxu0  ;;  %909 = vmatprep.subr.bf16.mxu0 %v782_v40  ;;  %1426 = vmatprep.subr.bf16.mxu1 %v782_v40  ;;  %v547_v39 = vpop.permute.xlu1 %546 }
 0x13c   : > { %v693_v46 = vadd.f32 %v692_v45, %v517_v44  ;;  %v694_v47 = vpop.f32.mrb[19].mxu0  ;;  %910 = vmatpush1.bf16.msra.mxu0 %v781_v38  ;;  %1434 = vmatpush1.bf16.msra.mxu1 %v781_v38  ;;  %v743_v49 = vmax.f32 %v689_v42, 0.0  ;;  %v1054_v60 = vpop.permute.xlu0 %1053 }
 0x13d   : > { %v695_v48 = vadd.f32 %v694_v47, %v517_v44  ;;  %v744_v51 = vmax.f32 %v691_v62, 0.0 }
 0x13e   : > { %v745_v50 = vmax.f32 %v693_v46, 0.0 }
 0x13f   : > { %v746_v53 = vmax.f32 %v695_v48, 0.0 }
 0x140   : > { %v783_v54 = vpack.c.bf16 %v745_v50, %v743_v49  ;;  %v1510_v49 = vld [vmem:[%s2072_s4] sm:$0xff]   ;;  %v1511_v50 = vld [vmem:[%s2072_s4 + $0x8] sm:$0xff]  }
 0x141   : > { %v784_v56 = vpack.c.bf16 %v746_v53, %v744_v51  ;;  %v698_v58 = vpop.f32.mrb[20].mxu0  ;;  %v797_v51 = vpop.permute.xlu1 %796 }
 0x142   : > { %v699_v61 = vadd.f32 %v698_v58, %v522_v55  ;;  %v700_v0 = vpop.f32.mrb[21].mxu0 }
 0x143   : > { %v701_v2 = vadd.f32 %v700_v0, %v522_v55  ;;  %v702_v3 = vpop.f32.mrb[22].mxu0  ;;  %911 = vmatprep.subr.bf16.mxu0 %v784_v56  ;;  %1427 = vmatprep.subr.bf16.mxu1 %v784_v56  ;;  %v1066_v0 = vpop.permute.xlu0 %1065 }
 0x144   : > { %v703_v10 = vadd.f32 %v702_v3, %v527_v1  ;;  %v704_v8 = vpop.f32.mrb[23].mxu0  ;;  %912 = vmatpush1.bf16.msra.mxu0 %v783_v54  ;;  %1435 = vmatpush1.bf16.msra.mxu1 %v783_v54  ;;  %v747_v17 = vmax.f32 %v699_v61, 0.0 }
 0x145   : > { %v705_v13 = vadd.f32 %v704_v8, %v527_v1  ;;  %v748_v18 = vmax.f32 %v701_v2, 0.0  ;;  %v801_v53 = vpop.permute.xlu1 %800 }
 0x146   : > { %v749_v57 = vmax.f32 %v703_v10, 0.0 }
 0x147   : > { %v750_v19 = vmax.f32 %v705_v13, 0.0  ;;  %v1969_v2 = vpop.permute.xlu0 %1077 }
 0x148   : > { %v785_v20 = vpack.c.bf16 %v749_v57, %v747_v17 }
 0x149   : > { %v786_v21 = vpack.c.bf16 %v750_v19, %v748_v18  ;;  %v708_v52 = vpop.f32.mrb[24].mxu0  ;;  %v1050_v54 = vpop.permute.xlu1 %1049 }
 0x14a   : > { %v709_v22 = vadd.f32 %v708_v52, %v532_v63  ;;  %v710_v25 = vpop.f32.mrb[25].mxu0 }
 0x14b   : > { %v711_v27 = vadd.f32 %v710_v25, %v532_v63  ;;  %v712_v28 = vpop.f32.mrb[26].mxu0  ;;  %913 = vmatprep.subr.bf16.mxu0 %v786_v21  ;;  %1428 = vmatprep.subr.bf16.mxu1 %v786_v21  ;;  %v1973_v3 = vpop.permute.xlu0 %1089 }
 0x14c   : > { %v713_v29 = vadd.f32 %v712_v28, %v537_v26  ;;  %v714_v30 = vpop.f32.mrb[27].mxu0  ;;  %914 = vmatpush1.bf16.msra.mxu0 %v785_v20  ;;  %1436 = vmatpush1.bf16.msra.mxu1 %v785_v20  ;;  %v751_v31 = vmax.f32 %v709_v22, 0.0 }
 0x14d   : > { %v715_v7 = vadd.f32 %v714_v30, %v537_v26  ;;  %v752_v33 = vmax.f32 %v711_v27, 0.0  ;;  %v809_v55 = vpop.permute.xlu1 %808 }
 0x14e   : > { %v753_v32 = vmax.f32 %v713_v29, 0.0 }
 0x14f   : > { %v754_v9 = vmax.f32 %v715_v7, 0.0  ;;  %v793_v8 = vpop.permute.xlu0 %792 }
 0x150   : > { %v787_v34 = vpack.c.bf16 %v753_v32, %v751_v31 }
 0x151   : > { %v788_v35 = vpack.c.bf16 %v754_v9, %v752_v33  ;;  %v718_v36 = vpop.f32.mrb[28].mxu0  ;;  %v1058_v56 = vpop.permute.xlu1 %1057 }
 0x152   : > { %v719_v37 = vadd.f32 %v718_v36, %v542_v59  ;;  %v720_v38 = vpop.f32.mrb[29].mxu0 }
 0x153   : > { %v721_v40 = vadd.f32 %v720_v38, %v542_v59  ;;  %v722_v41 = vpop.f32.mrb[30].mxu0  ;;  %915 = vmatprep.subr.bf16.mxu0 %v788_v35  ;;  %1429 = vmatprep.subr.bf16.mxu1 %v788_v35  ;;  %v805_v17 = vpop.permute.xlu0 %804 }
 0x154   : > { %v723_v42 = vadd.f32 %v722_v41, %v547_v39  ;;  %v724_v43 = vpop.f32.mrb[31].mxu0  ;;  %916 = vmatpush1.bf16.msra.mxu0 %v787_v34  ;;  %1437 = vmatpush1.bf16.msra.mxu1 %v787_v34  ;;  %v755_v62 = vmax.f32 %v719_v37, 0.0 }
 0x155   : > { %v725_v44 = vadd.f32 %v724_v43, %v547_v39  ;;  %v756_v46 = vmax.f32 %v721_v40, 0.0  ;;  %v1062_v58 = vpop.permute.xlu1 %1061 }
 0x156   : > { %v757_v45 = vmax.f32 %v723_v42, 0.0 }
 0x157   : > { %v758_v47 = vmax.f32 %v725_v44, 0.0  ;;  %v813_v40 = vpop.permute.xlu0 %812 }
 0x158   : > { %v789_v48 = vpack.c.bf16 %v757_v45, %v755_v62 }
 0x159   : > { %v790_v14 = vpack.c.bf16 %v758_v47, %v756_v46  ;;  %v1965_v61 = vpop.permute.xlu1 %816 }
 0x15b   : > { %917 = vmatprep.subr.bf16.mxu0 %v790_v14  ;;  %1430 = vmatprep.subr.bf16.mxu1 %v790_v14 }
 0x15c   : > { %918 = vmatpush1.bf16.msra.mxu0 %v789_v48  ;;  %1438 = vmatpush1.bf16.msra.mxu1 %v789_v48 }
 0x15d   : > { %v1967_v1 = vpop.permute.xlu1 %820 }
 0x15f   : > { %936 = vmatmul.mubr.bf16.vlgmr.msra.gmra.mrb[32].mxu0 %v1510_v49  ;;  %946 = vmatmul.mubr.bf16.vlgmr.msra.gmra.mrb[0].mxu1 %v1511_v50 }
 0x160   : > { %955 = vmatprep.mubr.bf16.mxu1 %v1593_v5 }
 0x167   : > { %956 = vmatmul.mubr.bf16.gmra.mrb[4].mxu1 %v1512_v11 }
 0x168   : > { %965 = vmatprep.mubr.bf16.mxu1 %v1593_v5 }
 0x16f   : > { %966 = vmatmul.mubr.bf16.gmra.mrb[8].mxu1 %v1513_v12 }
 0x170   : > { %975 = vmatprep.mubr.bf16.mxu1 %v1593_v5 }
 0x177   : > { %976 = vmatmul.mubr.bf16.gmra.mrb[12].mxu1 %v1514_v23 }
 0x178   : > { %985 = vmatprep.mubr.bf16.mxu1 %v1593_v5 }
 0x17f   : > { %986 = vmatmul.mubr.bf16.gmra.mrb[16].mxu1 %v1515_v15 }
 0x180   : > { %995 = vmatprep.mubr.bf16.mxu1 %v1593_v5 }
 0x187   : > { %996 = vmatmul.mubr.bf16.gmra.mrb[20].mxu1 %v1516_v16 }
 0x188   : > { %1005 = vmatprep.mubr.bf16.mxu1 %v1593_v5  ;;  %v1971_v5 = vpop.permute.xlu1 %1069 }
 0x18c   : > { %v1975_v10 = vpop.permute.xlu1 %1073 }
 0x18f   : > { %1006 = vmatmul.mubr.bf16.gmra.mrb[24].mxu1 %v1517_v24 }
 0x190   : > { %v1977_v13 = vpop.permute.xlu1 %828 }
 0x194   : > { %v1979_v57 = vpop.permute.xlu1 %832 }
 0x198   : > { %v1981_v62 = vpop.permute.xlu1 %1081 }
 0x232   : > { %v937_v18 = vpop.f32.mrb[32].mxu0  ;;  %v947_v19 = vpop.f32.mrb[0].mxu1 }
 0x233   : > { %v938_v20 = vadd.f32 %v937_v18, %v793_v8  ;;  %v948_v63 = vadd.f32 %v947_v19, %v801_v53  ;;  %v939_v21 = vpop.f32.mrb[33].mxu0  ;;  %v949_v52 = vpop.f32.mrb[1].mxu1 }
 0x234   : > { %v940_v22 = vadd.f32 %v939_v21, %v793_v8  ;;  %v950_v25 = vadd.f32 %v949_v52, %v801_v53  ;;  %v941_v26 = vpop.f32.mrb[34].mxu0  ;;  %v951_v27 = vpop.f32.mrb[2].mxu1 }
 0x235   : > { %v1016_v28 = vmax.f32 %v938_v20, 0.0  ;;  %v942_v29 = vadd.f32 %v941_v26, %v797_v51  ;;  %v952_v30 = vadd.f32 %v951_v27, %v805_v17  ;;  %v943_v7 = vpop.f32.mrb[35].mxu0  ;;  %v953_v31 = vpop.f32.mrb[3].mxu1  ;;  %v1020_v34 = vmax.f32 %v948_v63, 0.0 }
 0x236   : > { %v1017_v32 = vmax.f32 %v940_v22, 0.0  ;;  %v944_v33 = vadd.f32 %v943_v7, %v797_v51  ;;  %v954_v9 = vadd.f32 %v953_v31, %v805_v17  ;;  %v1021_v35 = vmax.f32 %v950_v25, 0.0  ;;  %v1086_v21 = vpop.permute.xlu1 %1085 }
 0x237   : > { %v1018_v59 = vmax.f32 %v942_v29, 0.0  ;;  %v1112_v37 = vmul.f32 %v1050_v54, %v1016_v28  ;;  %v1022_v39 = vmax.f32 %v952_v30, 0.0  ;;  %v1116_v45 = vmul.f32 %v1058_v56, %v1020_v34 }
 0x238   : > { %v1019_v36 = vmax.f32 %v944_v33, 0.0  ;;  %v1113_v41 = vmul.f32 %v1050_v54, %v1017_v32  ;;  %v1023_v43 = vmax.f32 %v954_v9, 0.0  ;;  %v1117_v14 = vmul.f32 %v1058_v56, %v1021_v35 }
 0x239   : > { %v1114_v38 = vmul.f32 %v1054_v60, %v1018_v59  ;;  %v1118_v12 = vmul.f32 %v1062_v58, %v1022_v39 }
 0x23a   : > { %v1115_v42 = vmul.f32 %v1054_v60, %v1019_v36  ;;  %v957_v44 = vpop.f32.mrb[4].mxu1  ;;  %v1119_v51 = vmul.f32 %v1062_v58, %v1023_v43  ;;  %v841_v9 = vpop.permute.xlu1 %840 }
 0x23b   : > { %v1144_v46 = vadd.f32 %v1114_v38, %v1112_v37  ;;  %v958_v47 = vadd.f32 %v957_v44, %v809_v55  ;;  %v959_v48 = vpop.f32.mrb[5].mxu1  ;;  %v825_v38 = vpop.permute.xlu0 %824 }
 0x23c   : > { %v1165_v49 = vadd.f32 %v1115_v42, %v1113_v41  ;;  %v960_v50 = vadd.f32 %v959_v48, %v809_v55  ;;  %v961_v11 = vpop.f32.mrb[6].mxu1 }
 0x23d   : > { %v1145_v23 = vadd.f32 %v1144_v46, %v1116_v45  ;;  %v1024_v15 = vmax.f32 %v958_v47, 0.0  ;;  %v962_v16 = vadd.f32 %v961_v11, %v813_v40  ;;  %v963_v24 = vpop.f32.mrb[7].mxu1 }
 0x23e   : > { %v1166_v53 = vadd.f32 %v1165_v49, %v1117_v14  ;;  %v1025_v54 = vmax.f32 %v960_v50, 0.0  ;;  %v964_v60 = vadd.f32 %v963_v24, %v813_v40  ;;  %v845_v46 = vpop.permute.xlu1 %844 }
 0x23f   : > { %v1146_v8 = vadd.f32 %v1145_v23, %v1118_v12  ;;  %v1120_v17 = vmul.f32 %v1066_v0, %v1024_v15  ;;  %v1026_v18 = vmax.f32 %v962_v16, 0.0 }
 0x240   : > { %v1167_v19 = vadd.f32 %v1166_v53, %v1119_v51  ;;  %v1121_v20 = vmul.f32 %v1066_v0, %v1025_v54  ;;  %v1027_v63 = vmax.f32 %v964_v60, 0.0 }
 0x241   : > { %v1147_v56 = vadd.f32 %v1146_v8, %v1120_v17  ;;  %v1122_v55 = vmul.f32 %v1971_v5, %v1026_v18  ;;  %v837_v17 = vpop.permute.xlu0 %836 }
 0x242   : > { %v1168_v52 = vadd.f32 %v1167_v19, %v1121_v20  ;;  %v1123_v22 = vmul.f32 %v1971_v5, %v1027_v63  ;;  %v967_v25 = vpop.f32.mrb[8].mxu1  ;;  %v1094_v53 = vpop.permute.xlu1 %1093 }
 0x243   : > { %v1148_v26 = vadd.f32 %v1147_v56, %v1122_v55  ;;  %v968_v58 = vadd.f32 %v967_v25, %v1965_v61  ;;  %v969_v27 = vpop.f32.mrb[9].mxu1 }
 0x244   : > { %v1169_v28 = vadd.f32 %v1168_v52, %v1123_v22  ;;  %v970_v29 = vadd.f32 %v969_v27, %v1965_v61  ;;  %v971_v30 = vpop.f32.mrb[10].mxu1 }
 0x245   : > { %v1028_v7 = vmax.f32 %v968_v58, 0.0  ;;  %v972_v0 = vadd.f32 %v971_v30, %v1967_v1  ;;  %v973_v31 = vpop.f32.mrb[11].mxu1 }
 0x246   : > { %v1029_v32 = vmax.f32 %v970_v29, 0.0  ;;  %v974_v33 = vadd.f32 %v973_v31, %v1967_v1 }
 0x247   : > { %v1124_v34 = vmul.f32 %v1975_v10, %v1028_v7  ;;  %v1030_v5 = vmax.f32 %v972_v0, 0.0 }
 0x248   : > { %v1125_v59 = vmul.f32 %v1975_v10, %v1029_v32  ;;  %v1031_v35 = vmax.f32 %v974_v33, 0.0 }
 0x249   : > { %v1149_v36 = vadd.f32 %v1148_v26, %v1124_v34  ;;  %v1126_v37 = vmul.f32 %v1969_v2, %v1030_v5  ;;  %v1098_v26 = vpop.permute.xlu1 %1097 }
 0x24a   : > { %v1170_v61 = vadd.f32 %v1169_v28, %v1125_v59  ;;  %v1127_v39 = vmul.f32 %v1969_v2, %v1031_v35  ;;  %v977_v40 = vpop.f32.mrb[12].mxu1  ;;  %v849_v28 = vpop.permute.xlu0 %848 }
 0x24b   : > { %v1150_v41 = vadd.f32 %v1149_v36, %v1126_v37  ;;  %v978_v42 = vadd.f32 %v977_v40, %v825_v38  ;;  %v979_v43 = vpop.f32.mrb[13].mxu1 }
 0x24c   : > { %v1171_v44 = vadd.f32 %v1170_v61, %v1127_v39  ;;  %v980_v1 = vadd.f32 %v979_v43, %v825_v38  ;;  %v981_v45 = vpop.f32.mrb[14].mxu1 }
 0x24d   : > { %v1032_v47 = vmax.f32 %v978_v42, 0.0  ;;  %v982_v48 = vadd.f32 %v981_v45, %v1977_v13  ;;  %v983_v10 = vpop.f32.mrb[15].mxu1  ;;  %v853_v5 = vpop.permute.xlu1 %852 }
 0x24e   : > { %v1033_v14 = vmax.f32 %v980_v1, 0.0  ;;  %v984_v49 = vadd.f32 %v983_v10, %v1977_v13  ;;  %v1102_v38 = vpop.permute.xlu0 %1101 }
 0x24f   : > { %v1128_v50 = vmul.f32 %v1981_v62, %v1032_v47  ;;  %v1034_v11 = vmax.f32 %v982_v48, 0.0 }
 0x250   : > { %v1129_v2 = vmul.f32 %v1981_v62, %v1033_v14  ;;  %v1035_v12 = vmax.f32 %v984_v49, 0.0 }
 0x251   : > { %v1151_v23 = vadd.f32 %v1150_v41, %v1128_v50  ;;  %v1130_v15 = vmul.f32 %v1086_v21, %v1034_v11  ;;  %v1106_v45 = vpop.permute.xlu1 %1105 }
 0x252   : > { %v1172_v16 = vadd.f32 %v1171_v44, %v1129_v2  ;;  %v1131_v24 = vmul.f32 %v1086_v21, %v1035_v12  ;;  %v987_v51 = vpop.f32.mrb[16].mxu1 }
 0x253   : > { %v1152_v54 = vadd.f32 %v1151_v23, %v1130_v15  ;;  %v988_v60 = vadd.f32 %v987_v51, %v1979_v57  ;;  %v989_v8 = vpop.f32.mrb[17].mxu1 }
 0x254   : > { %v1173_v18 = vadd.f32 %v1172_v16, %v1131_v24  ;;  %v990_v13 = vadd.f32 %v989_v8, %v1979_v57  ;;  %v991_v19 = vpop.f32.mrb[18].mxu1 }
 0x255   : > { %v1036_v20 = vmax.f32 %v988_v60, 0.0  ;;  %v992_v63 = vadd.f32 %v991_v19, %v837_v17  ;;  %v993_v56 = vpop.f32.mrb[19].mxu1  ;;  %v1110_v51 = vpop.permute.xlu1 %1109 }
 0x256   : > { %v1037_v62 = vmax.f32 %v990_v13, 0.0  ;;  %v994_v55 = vadd.f32 %v993_v56, %v837_v17 }
 0x257   : > { %v1132_v52 = vmul.f32 %v1973_v3, %v1036_v20  ;;  %v1038_v22 = vmax.f32 %v992_v63, 0.0 }
 0x258   : > { %v1133_v21 = vmul.f32 %v1973_v3, %v1037_v62  ;;  %v1039_v25 = vmax.f32 %v994_v55, 0.0  ;;  %v1598_v55 = vmov 1966171168  }
 0x259   : > { %v1153_v58 = vadd.f32 %v1152_v54, %v1132_v52  ;;  %v1134_v27 = vmul.f32 %v1094_v53, %v1038_v22  ;;  %v1233_v52 = vunpack.c.l.s4 %v1598_v55 }
 0x25a   : > { %v1174_v29 = vadd.f32 %v1173_v18, %v1133_v21  ;;  %v1135_v30 = vmul.f32 %v1094_v53, %v1039_v25  ;;  %v997_v7 = vpop.f32.mrb[20].mxu1 }
 0x25b   : > { %v1154_v57 = vadd.f32 %v1153_v58, %v1134_v27  ;;  %v998_v0 = vadd.f32 %v997_v7, %v841_v9  ;;  %v999_v31 = vpop.f32.mrb[21].mxu1  ;;  %v1234_v58 = vunpack.c.0.s8 %v1233_v52  ;;  %v1188_v27 = vpop.permute.xlu0 %1187 }
 0x25c   : > { %v1175_v32 = vadd.f32 %v1174_v29, %v1135_v30  ;;  %v1000_v33 = vadd.f32 %v999_v31, %v841_v9  ;;  %v1001_v34 = vpop.f32.mrb[22].mxu1  ;;  %v1218_v29 = vshrl.u32 %v373_v4, 7  ;;  %v1192_v4 = vld [vmem:[%s312_s11] ss:$4 sm:$0x3] }
 0x25d   : > { %v1040_v59 = vmax.f32 %v998_v0, 0.0  ;;  %v1002_v35 = vadd.f32 %v1001_v34, %v845_v46  ;;  %v1003_v36 = vpop.f32.mrb[23].mxu1 }
 0x25e   : > { %v1041_v37 = vmax.f32 %v1000_v33, 0.0  ;;  %v1004_v3 = vadd.f32 %v1003_v36, %v845_v46  ;;  %v1237_v31 = vsub.s32 %v1234_v58, %v1218_v29 }
 0x25f   : > { %v1136_v61 = vmul.f32 %v1098_v26, %v1040_v59  ;;  %v1042_v39 = vmax.f32 %v1002_v35, 0.0 }
 0x260   : > { %v1137_v40 = vmul.f32 %v1098_v26, %v1041_v37  ;;  %v1043_v41 = vmax.f32 %v1004_v3, 0.0 }
 0x261   : > { %v1155_v42 = vadd.f32 %v1154_v57, %v1136_v61  ;;  %v1138_v43 = vmul.f32 %v1102_v38, %v1042_v39  ;;  %v1526_v39 = vld [vmem:[%s1716_s29] ss:$4 sm:$0x3] }
 0x262   : > { %v1176_v44 = vadd.f32 %v1175_v32, %v1137_v40  ;;  %v1139_v1 = vmul.f32 %v1102_v38, %v1043_v41  ;;  %v1007_v47 = vpop.f32.mrb[24].mxu1  ;;  %v1413_v38 = vld [vmem:[%s312_s11 + $0x1] ss:$4 sm:$0x3]  ;;  %v1193_v40 = vmul.f32 %v1526_v39, %v1192_v4 }
 0x263   : > { %v1156_v48 = vadd.f32 %v1155_v42, %v1138_v43  ;;  %v1008_v9 = vadd.f32 %v1007_v47, %v849_v28  ;;  %v1009_v10 = vpop.f32.mrb[25].mxu1  ;;  %v1527_v41 = vld [vmem:[%s1716_s29 + $0x1] ss:$4 sm:$0x3] }
 0x264   : > { %v1177_v14 = vadd.f32 %v1176_v44, %v1139_v1  ;;  %v1010_v49 = vadd.f32 %v1009_v10, %v849_v28  ;;  %v1011_v50 = vpop.f32.mrb[26].mxu1  ;;  %v1196_v42 = vmul.f32 %v1527_v41, %v1413_v38  ;;  %v1414_v44 = vld [vmem:[%s312_s11 + $0x2] ss:$4 sm:$0x3] }
 0x265   : > { %v1044_v11 = vmax.f32 %v1008_v9, 0.0  ;;  %v1012_v2 = vadd.f32 %v1011_v50, %v853_v5  ;;  %v1013_v46 = vpop.f32.mrb[27].mxu1 }
 0x266   : > { %v1045_v12 = vmax.f32 %v1010_v49, 0.0  ;;  %v1014_v23 = vadd.f32 %v1013_v46, %v853_v5  ;;  %v1197_v47 = vadd.f32 %v1196_v42, %v1193_v40  ;;  %v1223_v49 = vsub.s32 1, %v1218_v29 }
 0x267   : > { %v1140_v15 = vmul.f32 %v1106_v45, %v1044_v11  ;;  %v1046_v16 = vmax.f32 %v1012_v2, 0.0 }
 0x268   : > { %v1141_v24 = vmul.f32 %v1106_v45, %v1045_v12  ;;  %v1047_v53 = vmax.f32 %v1014_v23, 0.0 }
 0x269   : > { %v1142_v54 = vmul.f32 %v1110_v51, %v1046_v16  ;;  %v1157_v60 = vadd.f32 %v1156_v48, %v1140_v15  ;;  %v1528_v48 = vld [vmem:[%s1716_s29 + $0x2] ss:$4 sm:$0x3] }
 0x26a   : > { %v1178_v8 = vadd.f32 %v1177_v14, %v1141_v24  ;;  %v1143_v17 = vmul.f32 %v1110_v51, %v1047_v53  ;;  %v1200_v9 = vmul.f32 %v1528_v48, %v1414_v44  ;;  %v1219_v14 = vsub.s32 0, %v1218_v29 }
 0x26b   : > { %v1158_v18 = vadd.f32 %v1157_v60, %v1142_v54 }
 0x26c   : > { %v1179_v13 = vadd.f32 %v1178_v8, %v1143_v17  ;;  %v1201_v10 = vadd.f32 %v1200_v9, %v1197_v47 }
 0x26d   : > { %v1159_v19 = vrot.slane %v1158_v18, 4 }
 0x26e   : > { %v1180_v20 = vrot.slane %v1179_v13, 4  ;;  %v1220_v50 = vrot.slane %v1201_v10, %v1219_v14  ;;  %v1224_v2 = vrot.slane %v1201_v10, %v1223_v49 }
 0x26f   : > { %v1160_v63 = vadd.f32 %v1159_v19, %v1158_v18 }
 0x270   : > { %v1181_v56 = vadd.f32 %v1180_v20, %v1179_v13 }
 0x271   : > { %v1161_v62 = vrot.slane %v1160_v63, 2 }
 0x272   : > { %v1182_v22 = vrot.slane %v1181_v56, 2 }
 0x273   : > { %v1162_v21 = vadd.f32 %v1161_v62, %v1160_v63 }
 0x274   : > { %v1183_v25 = vadd.f32 %v1182_v22, %v1181_v56 }
 0x275   : > { %v1163_v26 = vrot.slane %v1162_v21, 1 }
 0x276   : > { %v1184_v28 = vrot.slane %v1183_v25, 1 }
 0x277   : > { %v1164_v30 = vadd.f32 %v1163_v26, %v1162_v21 }
 0x278   : > { %v1185_v7 = vadd.f32 %v1184_v28, %v1183_v25 }
 0x279   : > { %v1190_v57 = vadd.f32 %v1188_v27, %v1164_v30 }
 0x27a   : > { %v1191_v0 = vadd.f32 %v1188_v27, %v1185_v7 }
 0x27b   : > { %v1202_v32 = vmax.f32 %v1190_v57, 1e-06 }
 0x27c   : > { %v1203_v33 = vmax.f32 %v1191_v0, 1e-06  ;;  %v1250_v34 = vcombine.low %v1190_v57, %v1191_v0 }
 0x27d   : > { %v1204_v5 = vmin.f32 %v1202_v32, 0.999999 }
 0x27e   : > { %v1205_v59 = vmin.f32 %v1203_v33, 0.999999  ;;  %v1257_v35 = vrot.slane %v1250_v34, %v1237_v31 }
 0x27f   : > { %v1206_v36 = vsub.f32 1.0, %v1204_v5 }
 0x280   : > { %v1207_v37 = vsub.f32 1.0, %v1205_v59  ;;  %v1264_v3 = vrot.slane %v1257_v35, %v1237_v31 }
 0x281   : > { %1518 = vrcp.f32 %v1206_v36 }
 0x282   : > { %1520 = vrcp.f32 %v1207_v37  ;;  %1415 = vst.msk [vmem:[%s2003_s28 + $0x1] ss:$2 sm:$0x3] %vm1700_vm0, %v1264_v3 }
 0x28b   : > { %v1519_v61 = vpop.eup %1518 }
 0x28c   : > { %v1521_v43 = vpop.eup %1520  ;;  %v1209_v1 = vmul.f32 %v1519_v61, %v1204_v5 }
 0x28d   : > { %v1211_v45 = vmul.f32 %v1521_v43, %v1205_v59 }
 0x28e   : > { %1522 = vlog2.f32 %v1209_v1 }
 0x28f   : > { %1524 = vlog2.f32 %v1211_v45 }
 0x298   : > { %v1523_v11 = vpop.eup %1522 }
 0x299   : > { %v1525_v46 = vpop.eup %1524  ;;  %v1213_v12 = vmul.f32 0.6931472, %v1523_v11 }
 0x29a   : > { %v1215_v23 = vmul.f32 0.6931472, %v1525_v46 }
 0x29b   : > { %v1227_v15 = vsub.f32 %v1213_v12, %v1220_v50 }
 0x29c   : > { %v1228_v16 = vsub.f32 %v1215_v23, %v1224_v2 }
 0x29e   : > { %v1231_v24 = vcombine.low %v1227_v15, %v1228_v16 }
 0x2a0   : > { %v1238_v51 = vrot.slane %v1231_v24, %v1237_v31 }
 0x2a2   : > { %v1245_v53 = vrot.slane %v1238_v51, %v1237_v31 }
 0x2a4   : > { %1247 = vst.msk [vmem:[%s2003_s28] ss:$2 sm:$0x3] %vm1700_vm0, %v1245_v53 }
 0x2a5   : > { %1542 = shalt.err (!%p1539_p7)
}
 0x2a6   : > { %s1543_s16 = scalar_lea.hbm %s2021_s13, 64  ;;  %s1547_s9 = scalar_lea.hbm %s2074_s6, 128 }
 0x2a7   : > { %p1544_p10 = scmp.ne.s32.totalorder %s2021_s13, %s1543_s16  ;;  %p1548_p13 = scmp.lt.u32.totalorder %s2021_s13, %s2074_s6 }
 0x2a8   : > { %p1549_p0 = scmp.lt.u32.totalorder %s1547_s9, %s1543_s16  ;;  %p1551_p2 = scmp.lt.u32.totalorder %s1543_s16, %s2021_s13 }
 0x2a9   : > { %p1545_p11 = pnand %p1544_p10, %p1674_p6 }
 0x2aa   : > { %p1550_p1 = por %p1549_p0, %p1548_p13 }
 0x2ab   : > { %p1546_p12 = pneg %p1545_p11 }
 0x2ac   : > { %p1552_p3 = por %p1551_p2, %p1550_p1 }
 0x2ae   : > { %p1553_p4 = pnand %p1552_p3, %p1546_p12 }
 0x2b0   : > { %1556 = shalt.err (!%p1553_p4)
}
 0x2b1   : > { %1439 = dma.vmem_to_hbm [thread:$0]  (%p1674_p6), %s2023_s20, 64, %s2021_s13, %s1269_s14  }
 0x2b2 PF: > { %s1295_s17 = sand.u32 1, %s1579_s21   ;;  %p1442_p5 = pnand %p1374_p9, %p1678_p8 }
 0x2b3   : > { %s1296_s29 = scalar_lea.sflag [#allocation5], %s1295_s17 }
 0x2b4   : > { %1574 = dma.done.wait (!%p1442_p5), %s1296_s29, 64  }
 0x2b5   : > { %1576 = vsyncadd (!%p1442_p5), %s1296_s29, 4294967232  ;;  %p16_p7 = scmp.ge.s32.totalorder %s1660_s27, 4   ;;  %s2079_s21 = smov %s1583_s22 }
 0x2b6   : > { %s2080_s22 = smov %s1587_s23  ;;  %s2081_s23 = smov %s1672_s30 }
 0x2b7   : > { %s2082_s24 = smov %s1660_s27  ;;  %18 = sbr.rel (!%p16_p7) target bundleno = 3 (0x3), region = 134 }
 0x2be   :  { %1301 = vsyncpa [#allocation5], 1 }
 0x2bf   :  { %1303 = vsyncpa [#allocation5 + $0x1], 1 }

</bundles_post_ra>
